<compile_context>
chip_gen: v6e
topology: v6e:2x2x1
jax: 0.10.0
libtpu: 0.0.40
codegen_flags: <defaults>
</compile_context>

<pallas_src>
import math
from functools import partial

import jax
import jax.numpy as jnp
from jax.experimental import pallas as pl
from jax.experimental.pallas import tpu as pltpu


# ---------------------------------------------------------------------------
# Tiled linear projection kernels (bf16 MXU inputs, f32 accumulation).
# ---------------------------------------------------------------------------
def _linear_kernel(x_ref, w_ref, o_ref, acc_ref):
    k = pl.program_id(2)

    @pl.when(k == 0)
    def _():
        acc_ref[...] = jnp.zeros_like(acc_ref)

    acc_ref[...] += jnp.dot(x_ref[...], w_ref[...],
                            preferred_element_type=jnp.float32)

    @pl.when(k == pl.num_programs(2) - 1)
    def _():
        o_ref[...] = acc_ref[...].astype(o_ref.dtype)


def _linear_bias_kernel(x_ref, w_ref, b_ref, o_ref, acc_ref):
    k = pl.program_id(2)

    @pl.when(k == 0)
    def _():
        acc_ref[...] = jnp.zeros_like(acc_ref)

    acc_ref[...] += jnp.dot(x_ref[...], w_ref[...],
                            preferred_element_type=jnp.float32)

    # Bias added only once, in the finalize (not per K step).
    @pl.when(k == pl.num_programs(2) - 1)
    def _():
        o_ref[...] = (acc_ref[...] + b_ref[...]).astype(o_ref.dtype)


def _pick_tile(dim, cap, align):
    """Largest multiple of `align` <= cap that divides dim, else the full dim."""
    if dim <= cap:
        return dim
    t = (cap // align) * align
    while t >= align:
        if dim % t == 0:
            return t
        t -= align
    return dim


def linear(x, w, b=None, *, out_dtype=jnp.bfloat16, tm=256, tn=256, tk=256):
    """x:[M,K] @ w:[K,N] (+ b:[1,N]) -> [M,N], tiled & pipelined over (M,N,K)."""
    M, K = x.shape
    N = w.shape[1]
    tm = _pick_tile(M, tm, 8)       # sublane-aligned
    tn = _pick_tile(N, tn, 128)     # lane-aligned
    tk = _pick_tile(K, tk, 128)     # lane-aligned
    grid = (M // tm, N // tn, K // tk)

    x_spec = pl.BlockSpec((tm, tk), lambda i, j, k: (i, k))
    w_spec = pl.BlockSpec((tk, tn), lambda i, j, k: (k, j))
    o_spec = pl.BlockSpec((tm, tn), lambda i, j, k: (i, j))
    scratch = [pltpu.VMEM((tm, tn), jnp.float32)]
    cparams = pltpu.CompilerParams(
        dimension_semantics=("parallel", "parallel", "arbitrary"))

    if b is None:
        return pl.pallas_call(
            _linear_kernel,
            out_shape=jax.ShapeDtypeStruct((M, N), out_dtype),
            grid=grid,
            in_specs=[x_spec, w_spec],
            out_specs=o_spec,
            scratch_shapes=scratch,
            compiler_params=cparams,
        )(x, w)

    b_spec = pl.BlockSpec((1, tn), lambda i, j, k: (0, j))
    return pl.pallas_call(
        _linear_bias_kernel,
        out_shape=jax.ShapeDtypeStruct((M, N), out_dtype),
        grid=grid,
        in_specs=[x_spec, w_spec, b_spec],
        out_specs=o_spec,
        scratch_shapes=scratch,
        compiler_params=cparams,
    )(x, w, b)


# ---------------------------------------------------------------------------
# Flash-style GQA attention kernel: grid = (B, G, q_blocks, kv_blocks).
# One grid step handles ALL heads of a group (stacked along the matmul M dim)
# so each K/V block is DMA'd once per group, not once per head.
# ---------------------------------------------------------------------------
def _gqa_flash_kernel(q_ref, k_ref, v_ref, o_ref,
                      qs_ref, m_ref, l_ref, acc_ref,
                      *, scale, group_size):
    kv = pl.program_id(3)
    s_q = q_ref.shape[0]      # query tile
    d_k = k_ref.shape[1]      # head dim

    @pl.when(kv == 0)
    def _():
        # Stack the group's heads along M (rows h*s_q + s) once per query
        # block; pre-apply 1/sqrt(d_k) and cast to bf16 for the MXU.
        # Only static, 128-lane-aligned slices are used (no reshapes).
        for h in range(group_size):
            qh = q_ref[:, h * d_k:(h + 1) * d_k].astype(jnp.float32) * scale
            qs_ref[h * s_q:(h + 1) * s_q, :] = qh.astype(jnp.bfloat16)
        m_ref[...] = jnp.full_like(m_ref, -jnp.inf)
        l_ref[...] = jnp.zeros_like(l_ref)
        acc_ref[...] = jnp.zeros_like(acc_ref)

    # scores: (group_size*s_q, s_kv) = Qstack @ K^T via dot_general contracting
    # the last dims (no explicit transpose -> feeds the MXU directly).
    s = jax.lax.dot_general(qs_ref[...], k_ref[...],
                            (((1,), (1,)), ((), ())),
                            preferred_element_type=jnp.float32)

    m_prev = m_ref[...]
    m_new = jnp.maximum(m_prev, jnp.max(s, axis=-1, keepdims=True))
    alpha = jnp.exp(m_prev - m_new)
    p = jnp.exp(s - m_new)
    l_ref[...] = alpha * l_ref[...] + jnp.sum(p, axis=-1, keepdims=True)
    acc_ref[...] = alpha * acc_ref[...] + jax.lax.dot_general(
        p.astype(jnp.bfloat16), v_ref[...],
        (((1,), (0,)), ((), ())),
        preferred_element_type=jnp.float32)
    m_ref[...] = m_new

    @pl.when(kv == pl.num_programs(3) - 1)
    def _():
        inv_l = pl.reciprocal(l_ref[...], approx=True)   # divide on the EUP
        ctx = acc_ref[...] * inv_l                       # (group_size*s_q, d_k)
        for h in range(group_size):
            o_ref[:, h * d_k:(h + 1) * d_k] = (
                ctx[h * s_q:(h + 1) * s_q, :].astype(o_ref.dtype))


# ---------------------------------------------------------------------------
# Forward pass (mask=None path of the reference module).
# ---------------------------------------------------------------------------
def gqa_forward(q, k, v, params, *, num_heads, num_groups,
                sq_tile=128, skv_tile=128):
    B, S, d_model = q.shape
    assert d_model % num_heads == 0 and num_heads % num_groups == 0
    d_k = d_model // num_heads
    group_size = num_heads // num_groups
    kv_dim = num_groups * d_k
    # Group/head slabs are selected along the lane (last) dim via index_maps,
    # which requires 128-aligned head slabs.
    assert d_k % 128 == 0, "this kernel assumes d_k is a multiple of 128"
    # TODO(synk): optional `mask` argument of the reference module is not
    # supported (this implements the mask=None path only).

    wq, wk, wv, wo, bo = params   # weights stored [in, out] in bf16, bias f32

    xq = q.reshape(B * S, d_model).astype(jnp.bfloat16)
    xk = k.reshape(B * S, d_model).astype(jnp.bfloat16)
    xv = v.reshape(B * S, d_model).astype(jnp.bfloat16)

    # Tiled, pipelined projections -> bf16 activations (free reshapes, no transposes).
    Q = linear(xq, wq).reshape(B, S, d_model)    # [B, S, H*d_k]
    K = linear(xk, wk).reshape(B, S, kv_dim)     # [B, S, G*d_k]
    V = linear(xv, wv).reshape(B, S, kv_dim)     # [B, S, G*d_k]

    s_q = _pick_tile(S, sq_tile, 8)
    s_kv = _pick_tile(S, skv_tile, 8)
    gsd = group_size * d_k
    scale = 1.0 / math.sqrt(d_k)

    grid = (B, num_groups, S // s_q, S // s_kv)
    ctx = pl.pallas_call(
        partial(_gqa_flash_kernel, scale=scale, group_size=group_size),
        out_shape=jax.ShapeDtypeStruct((B, S, d_model), jnp.bfloat16),
        grid=grid,
        in_specs=[
            # Q: group g's head slab (lane-aligned columns of width gs*d_k).
            pl.BlockSpec((None, s_q, gsd), lambda b, g, qi, kv: (b, qi, g)),
            # K/V: group g's d_k-wide slab; streamed once per group per kv block.
            pl.BlockSpec((None, s_kv, d_k), lambda b, g, qi, kv: (b, kv, g)),
            pl.BlockSpec((None, s_kv, d_k), lambda b, g, qi, kv: (b, kv, g)),
        ],
        # Lane-dense output slab written directly into [B, S, H*d_k].
        out_specs=pl.BlockSpec((None, s_q, gsd),
                               lambda b, g, qi, kv: (b, qi, g)),
        scratch_shapes=[
            pltpu.VMEM((group_size * s_q, d_k), jnp.bfloat16),  # stacked Q
            pltpu.VMEM((group_size * s_q, 1), jnp.float32),     # running max
            pltpu.VMEM((group_size * s_q, 1), jnp.float32),     # running sum
            pltpu.VMEM((group_size * s_q, d_k), jnp.float32),   # accumulator
        ],
        compiler_params=pltpu.CompilerParams(
            dimension_semantics=("parallel", "parallel", "parallel",
                                 "arbitrary")),
    )(Q, K, V)

    # ctx is already [B, S, H*d_k] == [B, S, d_model]: no transpose needed.
    out = linear(ctx.reshape(B * S, d_model), wo, bo, out_dtype=jnp.float32)
    return out.reshape(B, S, d_model)


# ---------------------------------------------------------------------------
# Pure-JAX reference (mirrors the PyTorch module and the bf16 MXU casts).
# ---------------------------------------------------------------------------
def gqa_reference(q, k, v, params, *, num_heads, num_groups):
    B, S, d_model = q.shape
    d_k = d_model // num_heads
    gs = num_heads // num_groups
    wq, wk, wv, wo, bo = params

    def mm(x, w):
        return jnp.dot(x.astype(jnp.bfloat16), w.astype(jnp.bfloat16),
                       preferred_element_type=jnp.float32)

    Q = mm(q.reshape(B * S, d_model), wq).astype(jnp.bfloat16)
    K = mm(k.reshape(B * S, d_model), wk).astype(jnp.bfloat16)
    V = mm(v.reshape(B * S, d_model), wv).astype(jnp.bfloat16)
    Q = Q.reshape(B, S, num_heads, d_k).transpose(0, 2, 1, 3)
    K = K.reshape(B, S, num_groups, d_k).transpose(0, 2, 1, 3)
    V = V.reshape(B, S, num_groups, d_k).transpose(0, 2, 1, 3)
    K = jnp.repeat(K, gs, axis=1)
    V = jnp.repeat(V, gs, axis=1)

    scale = 1.0 / math.sqrt(d_k)
    Qs = (Q.astype(jnp.float32) * scale).astype(jnp.bfloat16)
    score = jnp.einsum("bhqd,bhkd->bhqk", Qs, K,
                       preferred_element_type=jnp.float32)
    attn = jax.nn.softmax(score, axis=-1)
    ctx = jnp.einsum("bhqk,bhkd->bhqd", attn.astype(jnp.bfloat16), V,
                     preferred_element_type=jnp.float32).astype(jnp.bfloat16)
    ctx = ctx.transpose(0, 2, 1, 3).reshape(B * S, d_model)
    out = jnp.dot(ctx, wo.astype(jnp.bfloat16),
                  preferred_element_type=jnp.float32) + bo
    return out.reshape(B, S, d_model)


# ---------------------------------------------------------------------------
# Deterministic parameter init (PyTorch-Linear-style uniform bounds).
# Weights kept in bf16 (MXU inputs), bias in f32.
# ---------------------------------------------------------------------------
def init_params(key, d_model, num_heads, num_groups):
    d_k = d_model // num_heads
    kv_dim = num_groups * d_k
    ks = jax.random.split(key, 5)

    def unif(kk, shape, fan_in):
        bound = 1.0 / math.sqrt(fan_in)
        return jax.random.uniform(kk, shape, jnp.float32, -bound, bound)

    wq = unif(ks[0], (d_model, d_model), d_model).astype(jnp.bfloat16)
    wk = unif(ks[1], (d_model, kv_dim), d_model).astype(jnp.bfloat16)
    wv = unif(ks[2], (d_model, kv_dim), d_model).astype(jnp.bfloat16)
    wo = unif(ks[3], (d_model, d_model), d_model).astype(jnp.bfloat16)
    bo = unif(ks[4], (1, d_model), d_model)                       # f32
    return (wq, wk, wv, wo, bo)


if __name__ == "__main__":
    # Small but lane-aligned shapes: d_k = 128, two KV blocks, two query blocks,
    # multi-step K accumulation in the projections.
    B, S = 2, 256
    d_model, num_heads, num_groups = 512, 4, 2

    key = jax.random.PRNGKey(0)
    kq, kk, kv_, kp = jax.random.split(key, 4)
    q = jax.random.normal(kq, (B, S, d_model), jnp.float32)
    k = jax.random.normal(kk, (B, S, d_model), jnp.float32)
    v = jax.random.normal(kv_, (B, S, d_model), jnp.float32)
    params = init_params(kp, d_model, num_heads, num_groups)

    out = gqa_forward(q, k, v, params, num_heads=num_heads,
                      num_groups=num_groups)
    out = jax.block_until_ready(out)

    ref = gqa_reference(q, k, v, params, num_heads=num_heads,
                        num_groups=num_groups)
    assert out.shape == (B, S, d_model)
    max_err = float(jnp.max(jnp.abs(out - ref)))
    assert jnp.allclose(out, ref, atol=2e-2, rtol=2e-2), max_err
    print("KERNEL_OK")
</pallas_src>

<mosaic_0001>
module attributes {stable_mosaic.version = 11 : i64} {
  func.func @_linear_kernel(%arg0: i32, %arg1: i32, %arg2: i32, %arg3: memref<256x256xbf16, #tpu.memory_space<vmem>>, %arg4: memref<256x256xbf16, #tpu.memory_space<vmem>>, %arg5: memref<256x256xbf16, #tpu.memory_space<vmem>>, %arg6: memref<256x256xf32, #tpu.memory_space<vmem>>) attributes {dimension_semantics = [#tpu.dimension_semantics<parallel>, #tpu.dimension_semantics<parallel>, #tpu.dimension_semantics<arbitrary>], iteration_bounds = array<i64: 2, 2, 2>, scalar_prefetch = 0 : i64, scratch_operands = 1 : i64, tpu.core_type = #tpu.core_type<tc>, window_params = [{transform_indices = @transform_0, window_bounds = array<i64: 256, 256>}, {transform_indices = @transform_1, window_bounds = array<i64: 256, 256>}, {transform_indices = @transform_2, window_bounds = array<i64: 256, 256>}]} {
    %c0_i32 = arith.constant 0 : i32
    %0 = arith.cmpi eq, %arg2, %c0_i32 : i32
    %1 = arith.extui %0 : i1 to i32
    %c0_i32_0 = arith.constant 0 : i32
    %2 = arith.cmpi ne, %1, %c0_i32_0 : i32
    scf.if %2 {
      %cst_9 = arith.constant 0.000000e+00 : f32
      %12 = vector.broadcast %cst_9 : f32 to vector<256x256xf32>
      %c0_10 = arith.constant 0 : index
      %c0_11 = arith.constant 0 : index
      %13 = vector.load %arg6[%c0_10, %c0_11] : memref<256x256xf32, #tpu.memory_space<vmem>>, vector<256x256xf32>
      tpu.vector_store %arg6[%c0_10, %c0_11], %12 {strides = array<i32>} : memref<256x256xf32, #tpu.memory_space<vmem>>, vector<256x256xf32>,
    } else {
    }
    %c0 = arith.constant 0 : index
    %c0_1 = arith.constant 0 : index
    %3 = vector.load %arg6[%c0, %c0_1] : memref<256x256xf32, #tpu.memory_space<vmem>>, vector<256x256xf32>
    %c0_2 = arith.constant 0 : index
    %c0_3 = arith.constant 0 : index
    %4 = vector.load %arg3[%c0_2, %c0_3] : memref<256x256xbf16, #tpu.memory_space<vmem>>, vector<256x256xbf16>
    %c0_4 = arith.constant 0 : index
    %c0_5 = arith.constant 0 : index
    %5 = vector.load %arg4[%c0_4, %c0_5] : memref<256x256xbf16, #tpu.memory_space<vmem>>, vector<256x256xbf16>
    %cst = arith.constant dense<0.000000e+00> : vector<256x256xf32>
    %6 = tpu.matmul %4, %5, %cst {dimension_numbers = #tpu.dot_dimension_numbers<[1], [0], [0], [1], [0, 0, 1, 1], [], []>} : vector<256x256xbf16>, vector<256x256xbf16>, vector<256x256xf32> -> vector<256x256xf32>
    %7 = arith.addf %3, %6 : vector<256x256xf32>
    %c0_6 = arith.constant 0 : index
    %c0_7 = arith.constant 0 : index
    %8 = vector.load %arg6[%c0_6, %c0_7] : memref<256x256xf32, #tpu.memory_space<vmem>>, vector<256x256xf32>
    tpu.vector_store %arg6[%c0_6, %c0_7], %7 {strides = array<i32>} : memref<256x256xf32, #tpu.memory_space<vmem>>, vector<256x256xf32>,
    %c1_i32 = arith.constant 1 : i32
    %9 = arith.cmpi eq, %arg2, %c1_i32 : i32
    %10 = arith.extui %9 : i1 to i32
    %c0_i32_8 = arith.constant 0 : i32
    %11 = arith.cmpi ne, %10, %c0_i32_8 : i32
    scf.if %11 {
      %c0_9 = arith.constant 0 : index
      %c0_10 = arith.constant 0 : index
      %12 = vector.load %arg6[%c0_9, %c0_10] : memref<256x256xf32, #tpu.memory_space<vmem>>, vector<256x256xf32>
      %13 = arith.truncf %12 : vector<256x256xf32> to vector<256x256xbf16>
      %c0_11 = arith.constant 0 : index
      %c0_12 = arith.constant 0 : index
      %14 = vector.load %arg5[%c0_11, %c0_12] : memref<256x256xbf16, #tpu.memory_space<vmem>>, vector<256x256xbf16>
      tpu.vector_store %arg5[%c0_11, %c0_12], %13 {strides = array<i32>} : memref<256x256xbf16, #tpu.memory_space<vmem>>, vector<256x256xbf16>,
    } else {
    }
    return
  }
  func.func @transform_0(%arg0: i32, %arg1: i32, %arg2: i32) -> (i32, i32) {
    %c0_i32 = arith.constant 0 : i32
    return %arg0, %arg2 : i32, i32
  }
  func.func @transform_1(%arg0: i32, %arg1: i32, %arg2: i32) -> (i32, i32) {
    %c0_i32 = arith.constant 0 : i32
    return %arg2, %arg1 : i32, i32
  }
  func.func @transform_2(%arg0: i32, %arg1: i32, %arg2: i32) -> (i32, i32) {
    %c0_i32 = arith.constant 0 : i32
    return %arg0, %arg1 : i32, i32
  }
}

</mosaic_0001>

<bundles_post_ra>
// kernel: tpu_custom_call.1
= control target key start
LH: loop header
LB: loop body
LE: loop exit
PB: predicated region body
PF: predicated region fallthrough
CT: control target
= control target key end

     0   :  { %s2700_s0 = inlined_call_operand.hbm [shape: bf16[512,512], index: 0, kind: input, shape index: {}]   ;;  %s2701_s1 = inlined_call_operand.hbm [shape: bf16[512,512], index: 1, kind: input, shape index: {}]   ;;  %s2702_s2 = inlined_call_operand.hbm [shape: bf16[512,512], index: 2, kind: output, shape index: {}]  }
   0x1   :  { %2717 = sst [smem:[#allocation22_spill]] %s2700_s0 }
   0x2   :  { %2718 = sst [smem:[#allocation23_spill]] %s2701_s1 }
   0x3   :  { %2719 = sst [smem:[#allocation24_spill]] %s2702_s2 }
   0x4   :  { %7 = vsyncpa [#allocation4], 0 }
   0x5   :  { %9 = vsyncpa [#allocation4 + $0x1], 0 }
   0x6   :  { %10 = vsyncpa [#allocation7], 0 }
   0x7   :  { %12 = vsyncpa [#allocation7 + $0x1], 0 }
   0x8   :  { %13 = vsyncpa [#allocation5], 0 }
   0x9   :  { %15 = vsyncpa [#allocation5 + $0x1], 0  ;;  %s2194_s9 = smov 0   ;;  %s2196_s10 = smov 0  }
   0xa   :  { %s2198_s11 = smov 0   ;;  %s2200_s12 = smov 0  }
   0xb   :  { %s2202_s13 = smov 0   ;;  %s2204_s14 = smov 0  }
   0xc   :  { %s2206_s15 = smov 0   ;;  %s2208_s16 = smov 0  }
   0xd   :  { %s2210_s17 = smov 0   ;;  %s2212_s18 = smov 0  }
   0xe   :  { %s2214_s19 = smov 0   ;;  %s2216_s20 = smov 0  }
   0xf   :  { %s2218_s21 = smov 0   ;;  %s2220_s22 = smov 0  }
  0x10   :  { %s2222_s23 = smov 0   ;;  %s2224_s24 = smov 0  }
  0x11 LB: > { %2720 = sst [smem:[#allocation12_spill]] %s2135_s16  ;;  %s1507_s25 = sadd.s32 4294967295, %s2167_s24   ;;  %s2167_s24 = sphi %s2224_s24, %s21_s24   ;;  %s2163_s23 = sphi %s2222_s23, %s2765_s23   ;;  %s2159_s22 = sphi %s2220_s22, %s2764_s22   ;;  %s2155_s21 = sphi %s2218_s21, %s2777_s21   ;;  %s2151_s20 = sphi %s2216_s20, %s2776_s20   ;;  %s2147_s19 = sphi %s2214_s19, %s2775_s19   ;;  %s2143_s18 = sphi %s2212_s18, %s2774_s18   ;;  %s2139_s17 = sphi %s2210_s17, %s2773_s17   ;;  %s2135_s16 = sphi %s2208_s16, %s2772_s16   ;;  %s2131_s15 = sphi %s2206_s15, %s2760_s15   ;;  %s2127_s14 = sphi %s2204_s14, %s2771_s14   ;;  %s2123_s13 = sphi %s2202_s13, %s2770_s13   ;;  %s2119_s12 = sphi %s2200_s12, %s2769_s12   ;;  %s2115_s11 = sphi %s2198_s11, %s2768_s11   ;;  %s2111_s10 = sphi %s2196_s10, %s2767_s10   ;;  %s2107_s9 = sphi %s2194_s9, %s2766_s9  }
  0x12   : > { %2721 = sst [smem:[#allocation13_spill]] %s2143_s18  ;;  %s33_s26 = sadd.s32 1, %s2155_s21 }
  0x13   : > { %2722 = sst [smem:[#allocation14_spill]] %s2147_s19  ;;  %p2274_p0 = scmp.ge.s32.totalorder %s33_s26, 2 }
  0x14   : > { %2723 = sst [smem:[#allocation15_spill]] %s2151_s20  ;;  %p56_p1 = scmp.ne.s32.totalorder %s2139_s17, %s2135_s16 }
  0x15   : > { %2724 = sst [smem:[#allocation16_spill]] %s2159_s22  ;;  %s2779_s26 = smov (%p2274_p0, %s33_s26), 0 }
  0x16   : > { %2725 = sst [smem:[#allocation17_spill]] %s2163_s23  ;;  %p2709_p2 = scmp.eq.s32.totalorder %s2167_s24, 0 }
  0x17   : > { %2727 = sst [smem:[#allocation18_spill]] %s2779_s26  ;;  %p62_p3 = scmp.ne.s32.totalorder %s2135_s16, %s2131_s15 }
  0x18   : > { %s2290_s30 = ssub.s32 %s2155_s21, %s2779_s26  ;;  %p2292_p4 = scmp.eq.s32.totalorder %s1507_s25, 0 }
  0x19   : > { %p2298_p5 = por %p2709_p2, %p56_p1  ;;  %p2302_p6 = scmp.eq.s32.totalorder %s1507_s25, 7 }
  0x1a   : > { %p2308_p7 = por %p2292_p4, %p62_p3  ;;  %p2708_p8 = scmp.lt.s32.totalorder %s2167_s24, 8 }
  0x1b   : > { %s142_s7 = sand.u32 1, %s2139_s17   ;;  %s1513_s15 = sshll.u32 %s2155_s21, 1 }
  0x1c   : > { %s2731_s6 = scalar_select %p2308_p7, 1, 0 }
  0x1d   : > { %s1511_s8 = sshll.u32 %s142_s7, 8  ;;  %s1630_s29 = sshll.u32 %s2163_s23, 7 }
  0x1e   : > { %2732 = sst [smem:[#allocation19_spill]] %s2731_s6  ;;  %s146_s28 = scalar_lea.vmem [#allocation3], %s1511_s8 }
  0x1f   : > { %s156_s26 = sshll.u32 %s146_s28, 4  ;;  %s153_s2 = sadd.s32 %s1630_s29, %s1513_s15  ;;  %s157_s26 = int_to_ptr.vmem [resolvable:$true] %s156_s26 }
  0x20   : > { %s1515_s20 = sshll.u32 %s153_s2, 6  ;;  %p2320_p9 = pnand %p2708_p8, %p2298_p5 }
  0x21   : > { %s2734_s0 = sld [smem:[#allocation22_spill]]  ;;  %p1521_p10 = scmp.ge.s32.totalorder %s2167_s24, 1 }
  0x22   : > { %s143_s16 = scalar_lea.sflag [#allocation4], %s142_s7  ;;  %p1949_p11 = pneg %p2320_p9 }
  0x23   : > { %s1960_s8 = scalar_lea.vmem %s157_s26, 4096  ;;  %s2169_s2 = smov [#allocation3]  }
  0x24   : > { %p1961_p12 = scmp.ne.s32.totalorder %s157_s26, %s1960_s8  ;;  %s1965_s28 = sshll.u32 %s2169_s2, 4  ;;  %s1966_s28 = int_to_ptr.vmem [resolvable:$false] %s1965_s28 }
  0x25   : > { %s1967_s29 = scalar_lea.vmem %s1966_s28, 8192  ;;  %p1968_p3 = scmp.lt.s32.totalorder %s157_s26, %s1966_s28 }
  0x26   : > { %p1963_p13 = pnand %p1961_p12, %p1949_p11  ;;  %p1969_p5 = scmp.lt.s32.totalorder %s1967_s29, %s1960_s8 }
  0x27   : > { %s155_s6 = scalar_lea.hbm %s2734_s0, %s1515_s20 }
  0x28   : > { %p1964_p1 = pneg %p1963_p13  ;;  %p1970_p8 = por %p1969_p5, %p1968_p3 }
  0x2a   : > { %p1971_p2 = pnand %p1970_p8, %p1964_p1 }
  0x2c   : > { %1974 = shalt.err (!%p1971_p2)
}
  0x2d   : > { %s2710_s18 = smov 256   ;;  %s2711_s19 = smov 128  }
  0x2e   : > { %s2712_s20 = smov 8   ;;  %p188_p2 = scmp.lt.s32.totalorder %s2167_s24, 9 }
  0x2f   : > { %1706 = dma.hbm_to_vmem [thread:$0]  (!%p2320_p9), %s155_s6, 4096, %s157_s26, %s143_s16, %s2710_s18, %s2711_s19, %s2712_s20  }
  0x30   : > { %p2338_p8 = pnand %p1521_p10, %p188_p2  ;;  %s1508_s7 = sadd.s32 4294967294, %s2167_s24  }
  0x31   : > { %s36_s15 = sadd.s32 1, %s2159_s22  ;;  %s77_s25 = sadd.s32 1, %s2127_s14 }
  0x32   : > { %s2781_s15 = smov (!%p2274_p0, %s36_s15), %s2159_s22  ;;  %p84_p11 = scmp.ne.s32.totalorder %s2127_s14, %s2123_s13 }
  0x33   : > { %p38_p12 = scmp.ge.s32.totalorder %s2781_s15, 2  ;;  %p90_p9 = scmp.ne.s32.totalorder %s2123_s13, %s2119_s12 }
  0x34   : > { %p2736_p13 = scmp.eq.s32.totalorder %s2167_s24, 0  ;;  %s105_s26 = sadd.s32 1, %s2115_s11 }
  0x35   : > { %s2783_s15 = smov (%p38_p12, %s2781_s15), 0  ;;  %s2739_s6 = sadd.s32 1, %s2163_s23 }
  0x36   : > { %p2354_p1 = por %p84_p11, %p2736_p13  ;;  %2738 = sst [smem:[#allocation20_spill]] %s2783_s15 }
  0x37   : > { %s2785_s6 = smov (!%p38_p12, %s2739_s6), %s2163_s23  ;;  %s73_s27 = ssub.s32 %s2159_s22, %s2783_s15 }
  0x38   : > { %p2368_p0 = por %p90_p9, %p2292_p4  ;;  %p42_p10 = scmp.ge.s32.totalorder %s2785_s6, 2 }
  0x39   : > { %s74_s12 = sor.u32 %s73_s27, %s2290_s30  ;;  %p115_p5 = scmp.ne.s32.totalorder %s2115_s11, %s2111_s10 }
  0x3a   : > { %p75_p3 = scmp.eq.s32.totalorder %s74_s12, 0  ;;  %s2787_s6 = smov (%p42_p10, %s2785_s6), 0 }
  0x3b   : > { %2741 = sst [smem:[#allocation21_spill]] %s2787_s6  ;;  %s44_s3 = ssub.s32 %s2163_s23, %s2787_s6 }
  0x3c   : > { %s2378_s2 = scalar_select %p75_p3, %s2127_s14, %s77_s25  }
  0x3d   : > { %p2384_p2 = por %p2302_p6, %p115_p5  ;;  %s46_s29 = sor.u32 %s2290_s30, %s44_s3 }
  0x3e   : > { %s102_s18 = sor.u32 %s73_s27, %s44_s3  ;;  %p47_p4 = scmp.eq.s32.totalorder %s46_s29, 0 }
  0x3f   : > { %p103_p11 = scmp.eq.s32.totalorder %s102_s18, 0  ;;  %p121_p12 = scmp.ne.s32.totalorder %s2111_s10, %s2107_s9 }
  0x40   : > { %p122_p9 = scmp.eq.s32.totalorder %s1508_s7, 7  ;;  %s2743_s12 = sadd.s32 1, %s2139_s17 }
  0x41   : > { %s2394_s19 = scalar_select %p47_p4, %s2139_s17, %s2743_s12  }
  0x42   : > { %s2397_s20 = scalar_select %p103_p11, %s2115_s11, %s105_s26  }
  0x43   : > { %p2399_p13 = por %p122_p9, %p121_p12  ;;  %s166_s5 = sand.u32 1, %s2127_s14  }
  0x44   : > { %s1516_s0 = sshll.u32 %s166_s5, 8  ;;  %s1518_s6 = sshll.u32 %s2159_s22, 1 }
  0x45   : > { %s1631_s30 = sshll.u32 %s2155_s21, 7  ;;  %s170_s27 = scalar_lea.vmem [#allocation6], %s1516_s0 }
  0x46   : > { %s180_s3 = sshll.u32 %s170_s27, 4  ;;  %s177_s29 = sadd.s32 %s1631_s30, %s1518_s6  ;;  %s181_s3 = int_to_ptr.vmem [resolvable:$true] %s180_s3 }
  0x47   : > { %s1520_s18 = sshll.u32 %s177_s29, 6  ;;  %p2745_p6 = scmp.lt.s32.totalorder %s2167_s24, 8 }
  0x48   : > { %s2747_s1 = sld [smem:[#allocation23_spill]]  ;;  %s167_s23 = scalar_lea.sflag [#allocation7], %s166_s5 }
  0x49   : > { %p2410_p10 = pnand %p2745_p6, %p2354_p1  ;;  %s1988_s22 = scalar_lea.vmem %s181_s3, 4096 }
  0x4a   : > { %p1989_p5 = scmp.ne.s32.totalorder %s181_s3, %s1988_s22  ;;  %s2173_s0 = smov [#allocation6]  }
  0x4b   : > { %p1977_p3 = pneg %p2410_p10  ;;  %s1993_s6 = sshll.u32 %s2173_s0, 4  ;;  %s1994_s6 = int_to_ptr.vmem [resolvable:$false] %s1993_s6 }
  0x4c   : > { %s1995_s16 = scalar_lea.vmem %s1994_s6, 8192  ;;  %p1996_p1 = scmp.lt.s32.totalorder %s181_s3, %s1994_s6 }
  0x4d   : > { %p1991_p4 = pnand %p1989_p5, %p1977_p3  ;;  %p1997_p12 = scmp.lt.s32.totalorder %s1995_s16, %s1988_s22 }
  0x4e   : > { %s179_s15 = scalar_lea.hbm %s2747_s1, %s1520_s18 }
  0x4f   : > { %p1992_p11 = pneg %p1991_p4  ;;  %p1998_p9 = por %p1997_p12, %p1996_p1 }
  0x51   : > { %p1999_p6 = pnand %p1998_p9, %p1992_p11 }
  0x53   : > { %2002 = shalt.err (!%p1999_p6)
}
  0x54   : > { %s2748_s30 = smov 8   ;;  %s2749_s27 = smov 128  }
  0x55   : > { %s2750_s5 = smov 256   ;;  %192 = sbr.rel (%p2338_p8) target bundleno = 526 (0x20e), region = 28 }
  0x56   : > { %1709 = dma.hbm_to_vmem [thread:$0]  (!%p2410_p10), %s179_s15, 4096, %s181_s3, %s167_s23, %s2750_s5, %s2749_s27, %s2748_s30  }
  0x57   : > { %s2751_s29 = sld [smem:[#allocation12_spill]] (!%p2338_p8) }
  0x5d   : > { %s194_s26 = sand.u32 1, %s2751_s29  }
  0x5e   : > { %s1522_s12 = sshll.u32 %s194_s26, 8  ;;  %s195_s0 = scalar_lea.sflag [#allocation4], %s194_s26 }
  0x5f   : > { %s2427_s1 = scalar_lea.vmem [#allocation3], %s1522_s12 }
  0x60   : > { %2094 = dma.done.wait (%p2308_p7), %s195_s0, 4096  }
  0x61   : > { %2096 = vsyncadd (%p2308_p7), %s195_s0, 4294963200  ;;  %s203_s22 = sand.u32 1, %s2123_s13  }
  0x62   : > { %s1523_s7 = sshll.u32 %s203_s22, 8  ;;  %s204_s23 = scalar_lea.sflag [#allocation7], %s203_s22 }
  0x63   : > { %s2434_s15 = scalar_lea.vmem [#allocation6], %s1523_s7 }
  0x64   : > { %2098 = dma.done.wait (%p2368_p0), %s204_s23, 4096  }
  0x65   : > { %2100 = vsyncadd (%p2368_p0), %s204_s23, 4294963200  ;;  %s230_s4 = sand.u32 1, %s2111_s10   ;;  %s2753_s16 = sld [smem:[#allocation13_spill]] }
  0x66   : > { %s1524_s3 = sshll.u32 %s230_s4, 8 }
  0x67   : > { %s2443_s6 = scalar_lea.vmem [#allocation8], %s1524_s3 }
  0x6b   : > { %p1525_p7 = scmp.ne.s32.totalorder %s2753_s16, 0 }
  0x6d   : > { %242 = sbr.rel (%p1525_p7) target bundleno = 147 (0x93), region = 40 }
  0x72   : > { %v2174_v0 = vmov 0.0  }
  0x73   : > { %243 = vst [vmem:[#allocation2 + $0xb0] sm:$0xff] %v2174_v0  ;;  %244 = vst [vmem:[#allocation2 + $0x1b0] sm:$0xff] %v2174_v0 }
  0x74   : > { %245 = vst [vmem:[#allocation2 + $0xd8] sm:$0xff] %v2174_v0  ;;  %246 = vst [vmem:[#allocation2 + $0x18] sm:$0xff] %v2174_v0 }
  0x75   : > { %247 = vst [vmem:[#allocation2 + $0x50] sm:$0xff] %v2174_v0  ;;  %248 = vst [vmem:[#allocation2 + $0x168] sm:$0xff] %v2174_v0 }
  0x76   : > { %249 = vst [vmem:[#allocation2 + $0x130] sm:$0xff] %v2174_v0  ;;  %250 = vst [vmem:[#allocation2 + $0x48] sm:$0xff] %v2174_v0 }
  0x77   : > { %251 = vst [vmem:[#allocation2 + $0x180] sm:$0xff] %v2174_v0  ;;  %252 = vst [vmem:[#allocation2 + $0x110] sm:$0xff] %v2174_v0 }
  0x78   : > { %253 = vst [vmem:[#allocation2 + $0x118] sm:$0xff] %v2174_v0  ;;  %254 = vst [vmem:[#allocation2 + $0x98] sm:$0xff] %v2174_v0 }
  0x79   : > { %255 = vst [vmem:[#allocation2 + $0x120] sm:$0xff] %v2174_v0  ;;  %256 = vst [vmem:[#allocation2 + $0x150] sm:$0xff] %v2174_v0 }
  0x7a   : > { %257 = vst [vmem:[#allocation2 + $0x108] sm:$0xff] %v2174_v0  ;;  %258 = vst [vmem:[#allocation2 + $0x60] sm:$0xff] %v2174_v0 }
  0x7b   : > { %259 = vst [vmem:[#allocation2 + $0xe0] sm:$0xff] %v2174_v0  ;;  %260 = vst [vmem:[#allocation2 + $0x188] sm:$0xff] %v2174_v0 }
  0x7c   : > { %261 = vst [vmem:[#allocation2 + $0x138] sm:$0xff] %v2174_v0  ;;  %262 = vst [vmem:[#allocation2 + $0x140] sm:$0xff] %v2174_v0 }
  0x7d   : > { %263 = vst [vmem:[#allocation2 + $0x80] sm:$0xff] %v2174_v0  ;;  %264 = vst [vmem:[#allocation2 + $0x1a8] sm:$0xff] %v2174_v0 }
  0x7e   : > { %265 = vst [vmem:[#allocation2 + $0x1b8] sm:$0xff] %v2174_v0  ;;  %266 = vst [vmem:[#allocation2 + $0x28] sm:$0xff] %v2174_v0 }
  0x7f   : > { %267 = vst [vmem:[#allocation2 + $0x1e8] sm:$0xff] %v2174_v0  ;;  %268 = vst [vmem:[#allocation2 + $0xf8] sm:$0xff] %v2174_v0 }
  0x80   : > { %269 = vst [vmem:[#allocation2 + $0x160] sm:$0xff] %v2174_v0  ;;  %270 = vst [vmem:[#allocation2 + $0x30] sm:$0xff] %v2174_v0 }
  0x81   : > { %271 = vst [vmem:[#allocation2 + $0x1e0] sm:$0xff] %v2174_v0  ;;  %272 = vst [vmem:[#allocation2] sm:$0xff] %v2174_v0 }
  0x82   : > { %273 = vst [vmem:[#allocation2 + $0xf0] sm:$0xff] %v2174_v0  ;;  %274 = vst [vmem:[#allocation2 + $0x8] sm:$0xff] %v2174_v0 }
  0x83   : > { %275 = vst [vmem:[#allocation2 + $0x148] sm:$0xff] %v2174_v0  ;;  %276 = vst [vmem:[#allocation2 + $0x1d0] sm:$0xff] %v2174_v0 }
  0x84   : > { %277 = vst [vmem:[#allocation2 + $0x100] sm:$0xff] %v2174_v0  ;;  %278 = vst [vmem:[#allocation2 + $0xc8] sm:$0xff] %v2174_v0 }
  0x85   : > { %279 = vst [vmem:[#allocation2 + $0x40] sm:$0xff] %v2174_v0  ;;  %280 = vst [vmem:[#allocation2 + $0x1f8] sm:$0xff] %v2174_v0 }
  0x86   : > { %281 = vst [vmem:[#allocation2 + $0x20] sm:$0xff] %v2174_v0  ;;  %282 = vst [vmem:[#allocation2 + $0x128] sm:$0xff] %v2174_v0 }
  0x87   : > { %283 = vst [vmem:[#allocation2 + $0x1a0] sm:$0xff] %v2174_v0  ;;  %284 = vst [vmem:[#allocation2 + $0x1f0] sm:$0xff] %v2174_v0 }
  0x88   : > { %285 = vst [vmem:[#allocation2 + $0xe8] sm:$0xff] %v2174_v0  ;;  %286 = vst [vmem:[#allocation2 + $0x78] sm:$0xff] %v2174_v0 }
  0x89   : > { %287 = vst [vmem:[#allocation2 + $0x70] sm:$0xff] %v2174_v0  ;;  %288 = vst [vmem:[#allocation2 + $0x90] sm:$0xff] %v2174_v0 }
  0x8a   : > { %289 = vst [vmem:[#allocation2 + $0x1d8] sm:$0xff] %v2174_v0  ;;  %290 = vst [vmem:[#allocation2 + $0xd0] sm:$0xff] %v2174_v0 }
  0x8b   : > { %291 = vst [vmem:[#allocation2 + $0xb8] sm:$0xff] %v2174_v0  ;;  %292 = vst [vmem:[#allocation2 + $0x88] sm:$0xff] %v2174_v0 }
  0x8c   : > { %293 = vst [vmem:[#allocation2 + $0xa8] sm:$0xff] %v2174_v0  ;;  %294 = vst [vmem:[#allocation2 + $0x1c8] sm:$0xff] %v2174_v0 }
  0x8d   : > { %295 = vst [vmem:[#allocation2 + $0x170] sm:$0xff] %v2174_v0  ;;  %296 = vst [vmem:[#allocation2 + $0x178] sm:$0xff] %v2174_v0 }
  0x8e   : > { %297 = vst [vmem:[#allocation2 + $0x68] sm:$0xff] %v2174_v0  ;;  %298 = vst [vmem:[#allocation2 + $0x190] sm:$0xff] %v2174_v0 }
  0x8f   : > { %299 = vst [vmem:[#allocation2 + $0x198] sm:$0xff] %v2174_v0  ;;  %300 = vst [vmem:[#allocation2 + $0x38] sm:$0xff] %v2174_v0 }
  0x90   : > { %301 = vst [vmem:[#allocation2 + $0xc0] sm:$0xff] %v2174_v0  ;;  %302 = vst [vmem:[#allocation2 + $0x1c0] sm:$0xff] %v2174_v0 }
  0x91   : > { %303 = vst [vmem:[#allocation2 + $0x158] sm:$0xff] %v2174_v0  ;;  %304 = vst [vmem:[#allocation2 + $0x10] sm:$0xff] %v2174_v0 }
  0x92   : > { %305 = vst [vmem:[#allocation2 + $0x58] sm:$0xff] %v2174_v0  ;;  %306 = vst [vmem:[#allocation2 + $0xa0] sm:$0xff] %v2174_v0 }
  0x93 PF: > { %v1851_v1 = vld [vmem:[%s2434_s15 + $0x74] ss:$8 sps:$4 sm:$0xff]   ;;  %v1853_v2 = vld [vmem:[%s2434_s15 + $0x70] ss:$8 sps:$4 sm:$0xff]   ;;  %v1854_v3 = vld [vmem:[%s2434_s15 + $0x64] ss:$8 sps:$4 sm:$0xff]  }
  0x94   : > { %755 = vmatprep.subr.bf16.mxu0 %v1851_v1  ;;  %1665 = vmatprep.subr.bf16.mxu1 %v1851_v1  ;;  %v1856_v4 = vld [vmem:[%s2434_s15 + $0x60] ss:$8 sps:$4 sm:$0xff]   ;;  %v1857_v5 = vld [vmem:[%s2434_s15 + $0x54] ss:$8 sps:$4 sm:$0xff]   ;;  %v1859_v6 = vld [vmem:[%s2434_s15 + $0x50] ss:$8 sps:$4 sm:$0xff]  }
  0x95   : > { %756 = vmatpush1.bf16.msra.mxu0 %v1853_v2  ;;  %1681 = vmatpush1.bf16.msra.mxu1 %v1853_v2  ;;  %v1860_v7 = vld [vmem:[%s2434_s15 + $0x44] ss:$8 sps:$4 sm:$0xff]   ;;  %v1862_v8 = vld [vmem:[%s2434_s15 + $0x40] ss:$8 sps:$4 sm:$0xff]   ;;  %v1863_v9 = vld [vmem:[%s2434_s15 + $0x34] ss:$8 sps:$4 sm:$0xff]  }
  0x96   : > { %757 = vmatprep.subr.bf16.mxu0 %v1854_v3  ;;  %1666 = vmatprep.subr.bf16.mxu1 %v1854_v3  ;;  %v1865_v10 = vld [vmem:[%s2434_s15 + $0x30] ss:$8 sps:$4 sm:$0xff]   ;;  %v1866_v11 = vld [vmem:[%s2434_s15 + $0x24] ss:$8 sps:$4 sm:$0xff]   ;;  %v1868_v12 = vld [vmem:[%s2434_s15 + $0x20] ss:$8 sps:$4 sm:$0xff]  }
  0x97   : > { %v1869_v13 = vld [vmem:[%s2434_s15 + $0x14] ss:$8 sps:$4 sm:$0xff]   ;;  %v1901_v14 = vld [vmem:[%s2427_s1 + $0x4] ss:$8 sps:$4 sm:$0xff]   ;;  %v1871_v15 = vld [vmem:[%s2434_s15 + $0x10] ss:$8 sps:$4 sm:$0xff]  }
  0x98   : > { %v1904_v16 = vld [vmem:[%s2427_s1 + $0x84] ss:$8 sps:$4 sm:$0xff]   ;;  %787 = vmatprep.mubr.bf16.mxu0 %v1901_v14  ;;  %v1874_v18 = vld [vmem:[%s2434_s15] ss:$8 sps:$4 sm:$0xff]   ;;  %v1875_v19 = vld [vmem:[%s2434_s15 + $0xf4] ss:$8 sps:$4 sm:$0xff]  }
  0x99   : > { %758 = vmatpush1.bf16.msra.mxu0 %v1856_v4  ;;  %1682 = vmatpush1.bf16.msra.mxu1 %v1856_v4  ;;  %v1872_v17 = vld [vmem:[%s2434_s15 + $0x4] ss:$8 sps:$4 sm:$0xff]   ;;  %v1877_v20 = vld [vmem:[%s2434_s15 + $0xf0] ss:$8 sps:$4 sm:$0xff]   ;;  %v1880_v22 = vld [vmem:[%s2434_s15 + $0xe0] ss:$8 sps:$4 sm:$0xff]  }
  0x9a   : > { %759 = vmatprep.subr.bf16.mxu0 %v1857_v5  ;;  %1667 = vmatprep.subr.bf16.mxu1 %v1857_v5  ;;  %v1878_v21 = vld [vmem:[%s2434_s15 + $0xe4] ss:$8 sps:$4 sm:$0xff]   ;;  %v1881_v23 = vld [vmem:[%s2434_s15 + $0xd4] ss:$8 sps:$4 sm:$0xff]   ;;  %v1883_v24 = vld [vmem:[%s2434_s15 + $0xd0] ss:$8 sps:$4 sm:$0xff]  }
  0x9b   : > { %867 = vmatprep.mubr.bf16.mxu1 %v1904_v16  ;;  %v1884_v25 = vld [vmem:[%s2434_s15 + $0xc4] ss:$8 sps:$4 sm:$0xff]   ;;  %v1886_v26 = vld [vmem:[%s2434_s15 + $0xc0] ss:$8 sps:$4 sm:$0xff]   ;;  %v1887_v27 = vld [vmem:[%s2434_s15 + $0xb4] ss:$8 sps:$4 sm:$0xff]  }
  0x9c   : > { %v1889_v28 = vld [vmem:[%s2434_s15 + $0xb0] ss:$8 sps:$4 sm:$0xff]   ;;  %v1890_v29 = vld [vmem:[%s2434_s15 + $0xa4] ss:$8 sps:$4 sm:$0xff]   ;;  %v1892_v30 = vld [vmem:[%s2434_s15 + $0xa0] ss:$8 sps:$4 sm:$0xff]  }
  0x9d   : > { %760 = vmatpush1.bf16.msra.mxu0 %v1859_v6  ;;  %1683 = vmatpush1.bf16.msra.mxu1 %v1859_v6  ;;  %v1893_v31 = vld [vmem:[%s2434_s15 + $0x94] ss:$8 sps:$4 sm:$0xff]   ;;  %v1895_v32 = vld [vmem:[%s2434_s15 + $0x90] ss:$8 sps:$4 sm:$0xff]   ;;  %v1896_v33 = vld [vmem:[%s2434_s15 + $0x84] ss:$8 sps:$4 sm:$0xff]  }
  0x9e   : > { %761 = vmatprep.subr.bf16.mxu0 %v1860_v7  ;;  %1668 = vmatprep.subr.bf16.mxu1 %v1860_v7  ;;  %v1898_v34 = vld [vmem:[%s2434_s15 + $0x80] ss:$8 sps:$4 sm:$0xff]   ;;  %v1905_v37 = vld [vmem:[%s2427_s1 + $0x14] ss:$8 sps:$4 sm:$0xff]   ;;  %v1909_v39 = vld [vmem:[%s2427_s1 + $0x10] ss:$8 sps:$4 sm:$0xff]  }
  0x9f   : > { %v1899_v35 = vld [vmem:[%s2427_s1] ss:$8 sps:$4 sm:$0xff]   ;;  %v1907_v38 = vld [vmem:[%s2427_s1 + $0x94] ss:$8 sps:$4 sm:$0xff]   ;;  %v1910_v40 = vld [vmem:[%s2427_s1 + $0x90] ss:$8 sps:$4 sm:$0xff]  }
  0xa0   : > { %v1902_v36 = vld [vmem:[%s2427_s1 + $0x80] ss:$8 sps:$4 sm:$0xff]   ;;  %v1911_v41 = vld [vmem:[%s2427_s1 + $0x24] ss:$8 sps:$4 sm:$0xff]   ;;  %v1917_v45 = vld [vmem:[%s2427_s1 + $0x34] ss:$8 sps:$4 sm:$0xff]  }
  0xa1   : > { %762 = vmatpush1.bf16.msra.mxu0 %v1862_v8  ;;  %1684 = vmatpush1.bf16.msra.mxu1 %v1862_v8  ;;  %v1913_v42 = vld [vmem:[%s2427_s1 + $0xa4] ss:$8 sps:$4 sm:$0xff]   ;;  %v1915_v43 = vld [vmem:[%s2427_s1 + $0x20] ss:$8 sps:$4 sm:$0xff]   ;;  %v1919_v46 = vld [vmem:[%s2427_s1 + $0xb4] ss:$8 sps:$4 sm:$0xff]  }
  0xa2   : > { %763 = vmatprep.subr.bf16.mxu0 %v1863_v9  ;;  %1669 = vmatprep.subr.bf16.mxu1 %v1863_v9  ;;  %v1916_v44 = vld [vmem:[%s2427_s1 + $0xa0] ss:$8 sps:$4 sm:$0xff]   ;;  %v1921_v47 = vld [vmem:[%s2427_s1 + $0x30] ss:$8 sps:$4 sm:$0xff]   ;;  %v1923_v49 = vld [vmem:[%s2427_s1 + $0x44] ss:$8 sps:$4 sm:$0xff]  }
  0xa3   : > { %v1922_v48 = vld [vmem:[%s2427_s1 + $0xb0] ss:$8 sps:$4 sm:$0xff]   ;;  %v1925_v50 = vld [vmem:[%s2427_s1 + $0xc4] ss:$8 sps:$4 sm:$0xff]   ;;  %v1927_v51 = vld [vmem:[%s2427_s1 + $0x40] ss:$8 sps:$4 sm:$0xff]  }
  0xa4   : > { %v1928_v52 = vld [vmem:[%s2427_s1 + $0xc0] ss:$8 sps:$4 sm:$0xff]   ;;  %v1929_v53 = vld [vmem:[%s2427_s1 + $0x54] ss:$8 sps:$4 sm:$0xff]   ;;  %v1933_v55 = vld [vmem:[%s2427_s1 + $0x50] ss:$8 sps:$4 sm:$0xff]  }
  0xa5   : > { %764 = vmatpush1.bf16.msra.mxu0 %v1865_v10  ;;  %1685 = vmatpush1.bf16.msra.mxu1 %v1865_v10  ;;  %v1931_v54 = vld [vmem:[%s2427_s1 + $0xd4] ss:$8 sps:$4 sm:$0xff]   ;;  %v1934_v56 = vld [vmem:[%s2427_s1 + $0xd0] ss:$8 sps:$4 sm:$0xff]   ;;  %v1935_v57 = vld [vmem:[%s2427_s1 + $0x64] ss:$8 sps:$4 sm:$0xff]  }
  0xa6   : > { %765 = vmatprep.subr.bf16.mxu0 %v1866_v11  ;;  %1670 = vmatprep.subr.bf16.mxu1 %v1866_v11  ;;  %v1937_v58 = vld [vmem:[%s2427_s1 + $0xe4] ss:$8 sps:$4 sm:$0xff]   ;;  %v1939_v59 = vld [vmem:[%s2427_s1 + $0x60] ss:$8 sps:$4 sm:$0xff]   ;;  %v1941_v61 = vld [vmem:[%s2427_s1 + $0x74] ss:$8 sps:$4 sm:$0xff]  }
  0xa7   : > { %v1940_v60 = vld [vmem:[%s2427_s1 + $0xe0] ss:$8 sps:$4 sm:$0xff]   ;;  %v1943_v62 = vld [vmem:[%s2427_s1 + $0xf4] ss:$8 sps:$4 sm:$0xff]   ;;  %v1945_v63 = vld [vmem:[%s2427_s1 + $0x70] ss:$8 sps:$4 sm:$0xff]  }
  0xa8   : > { %v1946_v0 = vld [vmem:[%s2427_s1 + $0xf0] ss:$8 sps:$4 sm:$0xff]   ;;  %v339_v2 = vld [vmem:[#allocation2 + $0x148] sm:$0xff]  ;;  %s2754_s1 = sld [smem:[#allocation13_spill]] }
  0xa9   : > { %766 = vmatpush1.bf16.msra.mxu0 %v1868_v12  ;;  %1686 = vmatpush1.bf16.msra.mxu1 %v1868_v12  ;;  %v307_v1 = vld [vmem:[#allocation2 + $0xb0] sm:$0xff]  ;;  %v309_v11 = vld [vmem:[#allocation2 + $0xd8] sm:$0xff]  ;;  %v341_v12 = vld [vmem:[#allocation2 + $0x100] sm:$0xff] }
  0xaa   : > { %767 = vmatprep.subr.bf16.mxu0 %v1869_v13  ;;  %1671 = vmatprep.subr.bf16.mxu1 %v1869_v13  ;;  %v308_v5 = vld [vmem:[#allocation2 + $0x1b0] sm:$0xff] }
  0xab   : > { %v340_v6 = vld [vmem:[#allocation2 + $0x1d0] sm:$0xff] }
  0xad   : > { %768 = vmatpush1.bf16.msra.mxu0 %v1871_v15  ;;  %1687 = vmatpush1.bf16.msra.mxu1 %v1871_v15 }
  0xae   : > { %769 = vmatprep.subr.bf16.mxu0 %v1872_v17  ;;  %1672 = vmatprep.subr.bf16.mxu1 %v1872_v17  ;;  %v310_v17 = vld [vmem:[#allocation2 + $0x18] sm:$0xff]  ;;  %p1590_p8 = scmp.ne.s32.totalorder %s2754_s1, 1 }
  0xb1   : > { %770 = vmatpush1.bf16.msra.mxu0 %v1874_v18  ;;  %1688 = vmatpush1.bf16.msra.mxu1 %v1874_v18  ;;  %v342_v18 = vld [vmem:[#allocation2 + $0xc8] sm:$0xff] }
  0xb2   : > { %771 = vmatprep.subr.bf16.mxu0 %v1875_v19  ;;  %1673 = vmatprep.subr.bf16.mxu1 %v1875_v19 }
  0xb5   : > { %772 = vmatpush2.bf16.msra.mxu0 %v1877_v20  ;;  %1689 = vmatpush2.bf16.msra.mxu1 %v1877_v20 }
  0xb6   : > { %773 = vmatprep.subr.bf16.mxu0 %v1878_v21  ;;  %1674 = vmatprep.subr.bf16.mxu1 %v1878_v21 }
  0xb9   : > { %774 = vmatpush2.bf16.msra.mxu0 %v1880_v22  ;;  %1690 = vmatpush2.bf16.msra.mxu1 %v1880_v22 }
  0xba   : > { %775 = vmatprep.subr.bf16.mxu0 %v1881_v23  ;;  %1675 = vmatprep.subr.bf16.mxu1 %v1881_v23  ;;  %v311_v23 = vld [vmem:[#allocation2 + $0x50] sm:$0xff] }
  0xbd   : > { %776 = vmatpush2.bf16.msra.mxu0 %v1883_v24  ;;  %1691 = vmatpush2.bf16.msra.mxu1 %v1883_v24  ;;  %v343_v24 = vld [vmem:[#allocation2 + $0x40] sm:$0xff] }
  0xbe   : > { %777 = vmatprep.subr.bf16.mxu0 %v1884_v25  ;;  %1676 = vmatprep.subr.bf16.mxu1 %v1884_v25 }
  0xc1   : > { %778 = vmatpush2.bf16.msra.mxu0 %v1886_v26  ;;  %1692 = vmatpush2.bf16.msra.mxu1 %v1886_v26 }
  0xc2   : > { %779 = vmatprep.subr.bf16.mxu0 %v1887_v27  ;;  %1677 = vmatprep.subr.bf16.mxu1 %v1887_v27 }
  0xc5   : > { %780 = vmatpush2.bf16.msra.mxu0 %v1889_v28  ;;  %1693 = vmatpush2.bf16.msra.mxu1 %v1889_v28 }
  0xc6   : > { %781 = vmatprep.subr.bf16.mxu0 %v1890_v29  ;;  %1678 = vmatprep.subr.bf16.mxu1 %v1890_v29  ;;  %v312_v29 = vld [vmem:[#allocation2 + $0x168] sm:$0xff] }
  0xc9   : > { %782 = vmatpush2.bf16.msra.mxu0 %v1892_v30  ;;  %1694 = vmatpush2.bf16.msra.mxu1 %v1892_v30  ;;  %v344_v30 = vld [vmem:[#allocation2 + $0x1f8] sm:$0xff] }
  0xca   : > { %783 = vmatprep.subr.bf16.mxu0 %v1893_v31  ;;  %1679 = vmatprep.subr.bf16.mxu1 %v1893_v31 }
  0xcd   : > { %784 = vmatpush2.bf16.msra.mxu0 %v1895_v32  ;;  %1695 = vmatpush2.bf16.msra.mxu1 %v1895_v32 }
  0xce   : > { %785 = vmatprep.subr.bf16.mxu0 %v1896_v33  ;;  %1680 = vmatprep.subr.bf16.mxu1 %v1896_v33 }
  0xd1   : > { %786 = vmatpush2.bf16.msra.mxu0 %v1898_v34  ;;  %1696 = vmatpush2.bf16.msra.mxu1 %v1898_v34 }
  0xd4   : > { %788 = vmatmul.mubr.bf16.vlgmr.msra.gmra.mxu0 %v1899_v35  ;;  %868 = vmatmul.mubr.bf16.vlgmr.msra.gmra.mxu1 %v1902_v36  ;;  %v313_v35 = vld [vmem:[#allocation2 + $0x130] sm:$0xff]  ;;  %v345_v36 = vld [vmem:[#allocation2 + $0x20] sm:$0xff] }
  0xd5   : > { %797 = vmatprep.mubr.bf16.mxu0 %v1905_v37  ;;  %877 = vmatprep.mubr.bf16.mxu1 %v1907_v38 }
  0xdc   : > { %798 = vmatmul.mubr.bf16.gmra.mxu0 %v1909_v39  ;;  %878 = vmatmul.mubr.bf16.gmra.mxu1 %v1910_v40 }
  0xdd   : > { %807 = vmatprep.mubr.bf16.mxu0 %v1911_v41  ;;  %887 = vmatprep.mubr.bf16.mxu1 %v1913_v42  ;;  %v314_v41 = vld [vmem:[#allocation2 + $0x48] sm:$0xff] }
  0xde   : > { %v346_v42 = vld [vmem:[#allocation2 + $0x128] sm:$0xff] }
  0xe4   : > { %808 = vmatmul.mubr.bf16.gmra.mxu0 %v1915_v43  ;;  %888 = vmatmul.mubr.bf16.gmra.mxu1 %v1916_v44 }
  0xe5   : > { %817 = vmatprep.mubr.bf16.mxu0 %v1917_v45  ;;  %897 = vmatprep.mubr.bf16.mxu1 %v1919_v46 }
  0xec   : > { %818 = vmatmul.mubr.bf16.gmra.mxu0 %v1921_v47  ;;  %898 = vmatmul.mubr.bf16.gmra.mxu1 %v1922_v48  ;;  %v315_v47 = vld [vmem:[#allocation2 + $0x180] sm:$0xff] }
  0xed   : > { %827 = vmatprep.mubr.bf16.mxu0 %v1923_v49  ;;  %907 = vmatprep.mubr.bf16.mxu1 %v1925_v50  ;;  %v347_v48 = vld [vmem:[#allocation2 + $0x1a0] sm:$0xff] }
  0xf4   : > { %828 = vmatmul.mubr.bf16.gmra.mxu0 %v1927_v51  ;;  %908 = vmatmul.mubr.bf16.gmra.mxu1 %v1928_v52 }
  0xf5   : > { %837 = vmatprep.mubr.bf16.mxu0 %v1929_v53  ;;  %917 = vmatprep.mubr.bf16.mxu1 %v1931_v54  ;;  %v316_v53 = vld [vmem:[#allocation2 + $0x110] sm:$0xff] }
  0xf6   : > { %v348_v54 = vld [vmem:[#allocation2 + $0x1f0] sm:$0xff] }
  0xfc   : > { %838 = vmatmul.mubr.bf16.gmra.mxu0 %v1933_v55  ;;  %918 = vmatmul.mubr.bf16.gmra.mxu1 %v1934_v56 }
  0xfd   : > { %847 = vmatprep.mubr.bf16.mxu0 %v1935_v57  ;;  %927 = vmatprep.mubr.bf16.mxu1 %v1937_v58 }
 0x104   : > { %848 = vmatmul.mubr.bf16.gmra.mxu0 %v1939_v59  ;;  %928 = vmatmul.mubr.bf16.gmra.mxu1 %v1940_v60  ;;  %v317_v59 = vld [vmem:[#allocation2 + $0x118] sm:$0xff]  ;;  %v349_v60 = vld [vmem:[#allocation2 + $0xe8] sm:$0xff] }
 0x105   : > { %857 = vmatprep.mubr.bf16.mxu0 %v1941_v61  ;;  %937 = vmatprep.mubr.bf16.mxu1 %v1943_v62 }
 0x10c   : > { %858 = vmatmul.mubr.bf16.gmra.mxu0 %v1945_v63  ;;  %938 = vmatmul.mubr.bf16.gmra.mxu1 %v1946_v0 }
 0x194   : > { %v789_v3 = vpop.f32.mrf.mxu0  ;;  %v869_v4 = vpop.f32.mrf.mxu1 }
 0x195   : > { %v948_v7 = vadd.f32 %v789_v3, %v307_v1  ;;  %v980_v8 = vadd.f32 %v869_v4, %v339_v2  ;;  %v318_v1 = vld [vmem:[#allocation2 + $0x98] sm:$0xff] }
 0x196   : > { %v791_v9 = vpop.f32.mrf.mxu0  ;;  %v871_v10 = vpop.f32.mrf.mxu1  ;;  %v350_v2 = vld [vmem:[#allocation2 + $0x78] sm:$0xff] }
 0x197   : > { %1012 = vst [vmem:[#allocation2 + $0xb0] sm:$0xff] %v948_v7  ;;  %1044 = vst [vmem:[#allocation2 + $0x148] sm:$0xff] %v980_v8  ;;  %v949_v13 = vadd.f32 %v791_v9, %v308_v5  ;;  %v981_v14 = vadd.f32 %v871_v10, %v340_v6  ;;  %v319_v7 = vld [vmem:[#allocation2 + $0x120] sm:$0xff]  ;;  %v351_v8 = vld [vmem:[#allocation2 + $0x70] sm:$0xff] }
 0x198   : > { %v793_v15 = vpop.f32.mrf.mxu0  ;;  %v873_v16 = vpop.f32.mrf.mxu1 }
 0x199   : > { %1013 = vst [vmem:[#allocation2 + $0x1b0] sm:$0xff] %v949_v13  ;;  %1045 = vst [vmem:[#allocation2 + $0x1d0] sm:$0xff] %v981_v14  ;;  %v950_v19 = vadd.f32 %v793_v15, %v309_v11  ;;  %v982_v20 = vadd.f32 %v873_v16, %v341_v12  ;;  %v320_v13 = vld [vmem:[#allocation2 + $0x150] sm:$0xff] }
 0x19a   : > { %v795_v21 = vpop.f32.mrf.mxu0  ;;  %v875_v22 = vpop.f32.mrf.mxu1  ;;  %v352_v14 = vld [vmem:[#allocation2 + $0x90] sm:$0xff] }
 0x19b   : > { %1014 = vst [vmem:[#allocation2 + $0xd8] sm:$0xff] %v950_v19  ;;  %1046 = vst [vmem:[#allocation2 + $0x100] sm:$0xff] %v982_v20  ;;  %v951_v25 = vadd.f32 %v795_v21, %v310_v17  ;;  %v983_v26 = vadd.f32 %v875_v22, %v342_v18  ;;  %v321_v19 = vld [vmem:[#allocation2 + $0x108] sm:$0xff]  ;;  %v353_v20 = vld [vmem:[#allocation2 + $0x1d8] sm:$0xff] }
 0x19c   : > { %v799_v27 = vpop.f32.mrf.mxu0  ;;  %v879_v28 = vpop.f32.mrf.mxu1 }
 0x19d   : > { %1015 = vst [vmem:[#allocation2 + $0x18] sm:$0xff] %v951_v25  ;;  %1047 = vst [vmem:[#allocation2 + $0xc8] sm:$0xff] %v983_v26  ;;  %v952_v31 = vadd.f32 %v799_v27, %v311_v23  ;;  %v984_v32 = vadd.f32 %v879_v28, %v343_v24  ;;  %v322_v25 = vld [vmem:[#allocation2 + $0x60] sm:$0xff]  ;;  %v354_v26 = vld [vmem:[#allocation2 + $0xd0] sm:$0xff] }
 0x19e   : > { %v801_v33 = vpop.f32.mrf.mxu0  ;;  %v881_v34 = vpop.f32.mrf.mxu1 }
 0x19f   : > { %1016 = vst [vmem:[#allocation2 + $0x50] sm:$0xff] %v952_v31  ;;  %1048 = vst [vmem:[#allocation2 + $0x40] sm:$0xff] %v984_v32  ;;  %v953_v37 = vadd.f32 %v801_v33, %v312_v29  ;;  %v985_v38 = vadd.f32 %v881_v34, %v344_v30  ;;  %v323_v31 = vld [vmem:[#allocation2 + $0xe0] sm:$0xff]  ;;  %v355_v32 = vld [vmem:[#allocation2 + $0xb8] sm:$0xff] }
 0x1a0   : > { %v803_v39 = vpop.f32.mrf.mxu0  ;;  %v883_v40 = vpop.f32.mrf.mxu1 }
 0x1a1   : > { %1017 = vst [vmem:[#allocation2 + $0x168] sm:$0xff] %v953_v37  ;;  %1049 = vst [vmem:[#allocation2 + $0x1f8] sm:$0xff] %v985_v38  ;;  %v954_v43 = vadd.f32 %v803_v39, %v313_v35  ;;  %v986_v44 = vadd.f32 %v883_v40, %v345_v36  ;;  %v324_v37 = vld [vmem:[#allocation2 + $0x188] sm:$0xff] }
 0x1a2   : > { %v805_v45 = vpop.f32.mrf.mxu0  ;;  %v885_v46 = vpop.f32.mrf.mxu1  ;;  %v356_v38 = vld [vmem:[#allocation2 + $0x88] sm:$0xff] }
 0x1a3   : > { %1018 = vst [vmem:[#allocation2 + $0x130] sm:$0xff] %v954_v43  ;;  %1050 = vst [vmem:[#allocation2 + $0x20] sm:$0xff] %v986_v44  ;;  %v955_v49 = vadd.f32 %v805_v45, %v314_v41  ;;  %v987_v50 = vadd.f32 %v885_v46, %v346_v42  ;;  %v325_v43 = vld [vmem:[#allocation2 + $0x138] sm:$0xff]  ;;  %v357_v44 = vld [vmem:[#allocation2 + $0xa8] sm:$0xff] }
 0x1a4   : > { %v809_v51 = vpop.f32.mrf.mxu0  ;;  %v889_v52 = vpop.f32.mrf.mxu1 }
 0x1a5   : > { %1019 = vst [vmem:[#allocation2 + $0x48] sm:$0xff] %v955_v49  ;;  %1051 = vst [vmem:[#allocation2 + $0x128] sm:$0xff] %v987_v50  ;;  %v956_v55 = vadd.f32 %v809_v51, %v315_v47  ;;  %v988_v56 = vadd.f32 %v889_v52, %v347_v48  ;;  %v326_v49 = vld [vmem:[#allocation2 + $0x140] sm:$0xff]  ;;  %v358_v50 = vld [vmem:[#allocation2 + $0x1c8] sm:$0xff] }
 0x1a6   : > { %v811_v57 = vpop.f32.mrf.mxu0  ;;  %v891_v58 = vpop.f32.mrf.mxu1 }
 0x1a7   : > { %1020 = vst [vmem:[#allocation2 + $0x180] sm:$0xff] %v956_v55  ;;  %1052 = vst [vmem:[#allocation2 + $0x1a0] sm:$0xff] %v988_v56  ;;  %v957_v61 = vadd.f32 %v811_v57, %v316_v53  ;;  %v989_v62 = vadd.f32 %v891_v58, %v348_v54  ;;  %v327_v55 = vld [vmem:[#allocation2 + $0x80] sm:$0xff]  ;;  %v359_v56 = vld [vmem:[#allocation2 + $0x170] sm:$0xff] }
 0x1a8   : > { %v813_v63 = vpop.f32.mrf.mxu0  ;;  %v893_v0 = vpop.f32.mrf.mxu1 }
 0x1a9   : > { %1021 = vst [vmem:[#allocation2 + $0x110] sm:$0xff] %v957_v61  ;;  %1053 = vst [vmem:[#allocation2 + $0x1f0] sm:$0xff] %v989_v62  ;;  %v958_v3 = vadd.f32 %v813_v63, %v317_v59  ;;  %v990_v4 = vadd.f32 %v893_v0, %v349_v60  ;;  %v328_v61 = vld [vmem:[#allocation2 + $0x1a8] sm:$0xff]  ;;  %v360_v62 = vld [vmem:[#allocation2 + $0x178] sm:$0xff] }
 0x1aa   : > { %v815_v5 = vpop.f32.mrf.mxu0  ;;  %v895_v6 = vpop.f32.mrf.mxu1 }
 0x1ab   : > { %1022 = vst [vmem:[#allocation2 + $0x118] sm:$0xff] %v958_v3  ;;  %1054 = vst [vmem:[#allocation2 + $0xe8] sm:$0xff] %v990_v4  ;;  %v959_v9 = vadd.f32 %v815_v5, %v318_v1  ;;  %v991_v10 = vadd.f32 %v895_v6, %v350_v2  ;;  %v329_v3 = vld [vmem:[#allocation2 + $0x1b8] sm:$0xff]  ;;  %v361_v4 = vld [vmem:[#allocation2 + $0x68] sm:$0xff] }
 0x1ac   : > { %v819_v11 = vpop.f32.mrf.mxu0  ;;  %v899_v12 = vpop.f32.mrf.mxu1 }
 0x1ad   : > { %1023 = vst [vmem:[#allocation2 + $0x98] sm:$0xff] %v959_v9  ;;  %1055 = vst [vmem:[#allocation2 + $0x78] sm:$0xff] %v991_v10  ;;  %v960_v15 = vadd.f32 %v819_v11, %v319_v7  ;;  %v992_v16 = vadd.f32 %v899_v12, %v351_v8  ;;  %v330_v9 = vld [vmem:[#allocation2 + $0x28] sm:$0xff]  ;;  %v362_v10 = vld [vmem:[#allocation2 + $0x190] sm:$0xff] }
 0x1ae   : > { %v821_v17 = vpop.f32.mrf.mxu0  ;;  %v901_v18 = vpop.f32.mrf.mxu1 }
 0x1af   : > { %1024 = vst [vmem:[#allocation2 + $0x120] sm:$0xff] %v960_v15  ;;  %1056 = vst [vmem:[#allocation2 + $0x70] sm:$0xff] %v992_v16  ;;  %v961_v21 = vadd.f32 %v821_v17, %v320_v13  ;;  %v993_v22 = vadd.f32 %v901_v18, %v352_v14  ;;  %v331_v15 = vld [vmem:[#allocation2 + $0x1e8] sm:$0xff]  ;;  %v363_v16 = vld [vmem:[#allocation2 + $0x198] sm:$0xff] }
 0x1b0   : > { %v823_v23 = vpop.f32.mrf.mxu0  ;;  %v903_v24 = vpop.f32.mrf.mxu1 }
 0x1b1   : > { %1025 = vst [vmem:[#allocation2 + $0x150] sm:$0xff] %v961_v21  ;;  %1057 = vst [vmem:[#allocation2 + $0x90] sm:$0xff] %v993_v22  ;;  %v962_v27 = vadd.f32 %v823_v23, %v321_v19  ;;  %v994_v28 = vadd.f32 %v903_v24, %v353_v20  ;;  %v332_v21 = vld [vmem:[#allocation2 + $0xf8] sm:$0xff] }
 0x1b2   : > { %v825_v29 = vpop.f32.mrf.mxu0  ;;  %v905_v30 = vpop.f32.mrf.mxu1  ;;  %v364_v22 = vld [vmem:[#allocation2 + $0x38] sm:$0xff] }
 0x1b3   : > { %1026 = vst [vmem:[#allocation2 + $0x108] sm:$0xff] %v962_v27  ;;  %1058 = vst [vmem:[#allocation2 + $0x1d8] sm:$0xff] %v994_v28  ;;  %v963_v33 = vadd.f32 %v825_v29, %v322_v25  ;;  %v995_v34 = vadd.f32 %v905_v30, %v354_v26  ;;  %v333_v27 = vld [vmem:[#allocation2 + $0x160] sm:$0xff] }
 0x1b4   : > { %v829_v35 = vpop.f32.mrf.mxu0  ;;  %v909_v36 = vpop.f32.mrf.mxu1  ;;  %v365_v28 = vld [vmem:[#allocation2 + $0xc0] sm:$0xff] }
 0x1b5   : > { %1027 = vst [vmem:[#allocation2 + $0x60] sm:$0xff] %v963_v33  ;;  %1059 = vst [vmem:[#allocation2 + $0xd0] sm:$0xff] %v995_v34  ;;  %v964_v39 = vadd.f32 %v829_v35, %v323_v31  ;;  %v996_v40 = vadd.f32 %v909_v36, %v355_v32  ;;  %v334_v33 = vld [vmem:[#allocation2 + $0x30] sm:$0xff]  ;;  %v366_v34 = vld [vmem:[#allocation2 + $0x1c0] sm:$0xff] }
 0x1b6   : > { %v831_v41 = vpop.f32.mrf.mxu0  ;;  %v911_v42 = vpop.f32.mrf.mxu1 }
 0x1b7   : > { %1028 = vst [vmem:[#allocation2 + $0xe0] sm:$0xff] %v964_v39  ;;  %1060 = vst [vmem:[#allocation2 + $0xb8] sm:$0xff] %v996_v40  ;;  %v965_v45 = vadd.f32 %v831_v41, %v324_v37  ;;  %v997_v46 = vadd.f32 %v911_v42, %v356_v38  ;;  %v335_v39 = vld [vmem:[#allocation2 + $0x1e0] sm:$0xff]  ;;  %v367_v40 = vld [vmem:[#allocation2 + $0x158] sm:$0xff] }
 0x1b8   : > { %v833_v47 = vpop.f32.mrf.mxu0  ;;  %v913_v48 = vpop.f32.mrf.mxu1 }
 0x1b9   : > { %1029 = vst [vmem:[#allocation2 + $0x188] sm:$0xff] %v965_v45  ;;  %1061 = vst [vmem:[#allocation2 + $0x88] sm:$0xff] %v997_v46  ;;  %v966_v51 = vadd.f32 %v833_v47, %v325_v43  ;;  %v998_v52 = vadd.f32 %v913_v48, %v357_v44  ;;  %v336_v45 = vld [vmem:[#allocation2] sm:$0xff]  ;;  %v368_v46 = vld [vmem:[#allocation2 + $0x10] sm:$0xff] }
 0x1ba   : > { %v835_v53 = vpop.f32.mrf.mxu0  ;;  %v915_v54 = vpop.f32.mrf.mxu1 }
 0x1bb   : > { %1030 = vst [vmem:[#allocation2 + $0x138] sm:$0xff] %v966_v51  ;;  %1062 = vst [vmem:[#allocation2 + $0xa8] sm:$0xff] %v998_v52  ;;  %v967_v57 = vadd.f32 %v835_v53, %v326_v49  ;;  %v999_v58 = vadd.f32 %v915_v54, %v358_v50  ;;  %v337_v51 = vld [vmem:[#allocation2 + $0xf0] sm:$0xff]  ;;  %v369_v52 = vld [vmem:[#allocation2 + $0x58] sm:$0xff] }
 0x1bc   : > { %v839_v59 = vpop.f32.mrf.mxu0  ;;  %v919_v60 = vpop.f32.mrf.mxu1 }
 0x1bd   : > { %1031 = vst [vmem:[#allocation2 + $0x140] sm:$0xff] %v967_v57  ;;  %1063 = vst [vmem:[#allocation2 + $0x1c8] sm:$0xff] %v999_v58  ;;  %v968_v63 = vadd.f32 %v839_v59, %v327_v55  ;;  %v1000_v0 = vadd.f32 %v919_v60, %v359_v56  ;;  %v338_v57 = vld [vmem:[#allocation2 + $0x8] sm:$0xff]  ;;  %v370_v58 = vld [vmem:[#allocation2 + $0xa0] sm:$0xff] }
 0x1be   : > { %v841_v1 = vpop.f32.mrf.mxu0  ;;  %v921_v2 = vpop.f32.mrf.mxu1 }
 0x1bf   : > { %1032 = vst [vmem:[#allocation2 + $0x80] sm:$0xff] %v968_v63  ;;  %1064 = vst [vmem:[#allocation2 + $0x170] sm:$0xff] %v1000_v0  ;;  %v969_v5 = vadd.f32 %v841_v1, %v328_v61  ;;  %v1001_v6 = vadd.f32 %v921_v2, %v360_v62 }
 0x1c0   : > { %v843_v7 = vpop.f32.mrf.mxu0  ;;  %v923_v8 = vpop.f32.mrf.mxu1 }
 0x1c1   : > { %1033 = vst [vmem:[#allocation2 + $0x1a8] sm:$0xff] %v969_v5  ;;  %1065 = vst [vmem:[#allocation2 + $0x178] sm:$0xff] %v1001_v6  ;;  %v970_v11 = vadd.f32 %v843_v7, %v329_v3  ;;  %v1002_v12 = vadd.f32 %v923_v8, %v361_v4 }
 0x1c2   : > { %v845_v13 = vpop.f32.mrf.mxu0  ;;  %v925_v14 = vpop.f32.mrf.mxu1 }
 0x1c3   : > { %1034 = vst [vmem:[#allocation2 + $0x1b8] sm:$0xff] %v970_v11  ;;  %1066 = vst [vmem:[#allocation2 + $0x68] sm:$0xff] %v1002_v12  ;;  %v971_v17 = vadd.f32 %v845_v13, %v330_v9  ;;  %v1003_v18 = vadd.f32 %v925_v14, %v362_v10 }
 0x1c4   : > { %v849_v19 = vpop.f32.mrf.mxu0  ;;  %v929_v20 = vpop.f32.mrf.mxu1 }
 0x1c5   : > { %1035 = vst [vmem:[#allocation2 + $0x28] sm:$0xff] %v971_v17  ;;  %1067 = vst [vmem:[#allocation2 + $0x190] sm:$0xff] %v1003_v18  ;;  %v972_v23 = vadd.f32 %v849_v19, %v331_v15  ;;  %v1004_v24 = vadd.f32 %v929_v20, %v363_v16 }
 0x1c6   : > { %v851_v25 = vpop.f32.mrf.mxu0  ;;  %v931_v26 = vpop.f32.mrf.mxu1 }
 0x1c7   : > { %1036 = vst [vmem:[#allocation2 + $0x1e8] sm:$0xff] %v972_v23  ;;  %1068 = vst [vmem:[#allocation2 + $0x198] sm:$0xff] %v1004_v24  ;;  %v973_v29 = vadd.f32 %v851_v25, %v332_v21  ;;  %v1005_v30 = vadd.f32 %v931_v26, %v364_v22 }
 0x1c8   : > { %v853_v31 = vpop.f32.mrf.mxu0  ;;  %v933_v32 = vpop.f32.mrf.mxu1 }
 0x1c9   : > { %1037 = vst [vmem:[#allocation2 + $0xf8] sm:$0xff] %v973_v29  ;;  %1069 = vst [vmem:[#allocation2 + $0x38] sm:$0xff] %v1005_v30  ;;  %v974_v35 = vadd.f32 %v853_v31, %v333_v27  ;;  %v1006_v36 = vadd.f32 %v933_v32, %v365_v28 }
 0x1ca   : > { %v855_v37 = vpop.f32.mrf.mxu0  ;;  %v935_v38 = vpop.f32.mrf.mxu1 }
 0x1cb   : > { %1038 = vst [vmem:[#allocation2 + $0x160] sm:$0xff] %v974_v35  ;;  %1070 = vst [vmem:[#allocation2 + $0xc0] sm:$0xff] %v1006_v36  ;;  %v975_v41 = vadd.f32 %v855_v37, %v334_v33  ;;  %v1007_v42 = vadd.f32 %v935_v38, %v366_v34 }
 0x1cc   : > { %v859_v43 = vpop.f32.mrf.mxu0  ;;  %v939_v44 = vpop.f32.mrf.mxu1 }
 0x1cd   : > { %1039 = vst [vmem:[#allocation2 + $0x30] sm:$0xff] %v975_v41  ;;  %1071 = vst [vmem:[#allocation2 + $0x1c0] sm:$0xff] %v1007_v42  ;;  %v976_v47 = vadd.f32 %v859_v43, %v335_v39  ;;  %v1008_v48 = vadd.f32 %v939_v44, %v367_v40 }
 0x1ce   : > { %v861_v49 = vpop.f32.mrf.mxu0  ;;  %v941_v50 = vpop.f32.mrf.mxu1 }
 0x1cf   : > { %1040 = vst [vmem:[#allocation2 + $0x1e0] sm:$0xff] %v976_v47  ;;  %1072 = vst [vmem:[#allocation2 + $0x158] sm:$0xff] %v1008_v48  ;;  %v977_v53 = vadd.f32 %v861_v49, %v336_v45  ;;  %v1009_v54 = vadd.f32 %v941_v50, %v368_v46 }
 0x1d0   : > { %v863_v55 = vpop.f32.mrf.mxu0  ;;  %v943_v56 = vpop.f32.mrf.mxu1 }
 0x1d1   : > { %1041 = vst [vmem:[#allocation2] sm:$0xff] %v977_v53  ;;  %1073 = vst [vmem:[#allocation2 + $0x10] sm:$0xff] %v1009_v54  ;;  %v978_v59 = vadd.f32 %v863_v55, %v337_v51  ;;  %v1010_v60 = vadd.f32 %v943_v56, %v369_v52  ;;  %1079 = sbr.rel (%p1590_p8) target bundleno = 497 (0x1f1), region = 44 }
 0x1d2   : > { %v865_v61 = vpop.f32.mrf.mxu0  ;;  %v945_v62 = vpop.f32.mrf.mxu1 }
 0x1d3   : > { %1042 = vst [vmem:[#allocation2 + $0xf0] sm:$0xff] %v978_v59  ;;  %1074 = vst [vmem:[#allocation2 + $0x58] sm:$0xff] %v1010_v60  ;;  %v979_v63 = vadd.f32 %v865_v61, %v338_v57  ;;  %v1011_v0 = vadd.f32 %v945_v62, %v370_v58 }
 0x1d5   : > { %1043 = vst [vmem:[#allocation2 + $0x8] sm:$0xff] %v979_v63  ;;  %1075 = vst [vmem:[#allocation2 + $0xa0] sm:$0xff] %v1011_v0 }
 0x1d6   : > { %v1080_v1 = vld [vmem:[#allocation2 + $0xb0] sm:$0xff]  ;;  %v1082_v3 = vld [vmem:[#allocation2 + $0xd8] sm:$0xff]  ;;  %v1085_v7 = vld [vmem:[#allocation2 + $0x168] sm:$0xff] }
 0x1d7   : > { %v1081_v2 = vld [vmem:[#allocation2 + $0x1b0] sm:$0xff]  ;;  %v1083_v5 = vld [vmem:[#allocation2 + $0x18] sm:$0xff]  ;;  %v1087_v11 = vld [vmem:[#allocation2 + $0x48] sm:$0xff] }
 0x1d8   : > { %v1632_v4 = vpack.c.bf16 %v1081_v2, %v1080_v1  ;;  %v1084_v6 = vld [vmem:[#allocation2 + $0x50] sm:$0xff]  ;;  %v1633_v8 = vpack.c.bf16 %v1083_v5, %v1082_v3  ;;  %v1088_v12 = vld [vmem:[#allocation2 + $0x180] sm:$0xff]  ;;  %v1090_v15 = vld [vmem:[#allocation2 + $0x118] sm:$0xff] }
 0x1d9   : > { %v1634_v9 = vpack.c.bf16 %v1085_v7, %v1084_v6  ;;  %v1086_v10 = vld [vmem:[#allocation2 + $0x130] sm:$0xff]  ;;  %v1091_v16 = vld [vmem:[#allocation2 + $0x98] sm:$0xff]  ;;  %v1092_v19 = vld [vmem:[#allocation2 + $0x120] sm:$0xff] }
 0x1da   : > { %1336 = vst [vmem:[%s2443_s6] sm:$0xff] %v1632_v4  ;;  %v1635_v13 = vpack.c.bf16 %v1087_v11, %v1086_v10  ;;  %v1089_v14 = vld [vmem:[#allocation2 + $0x110] sm:$0xff]  ;;  %1337 = vst [vmem:[%s2443_s6 + $0x8] sm:$0xff] %v1633_v8  ;;  %v1637_v18 = vpack.c.bf16 %v1091_v16, %v1090_v15  ;;  %v1094_v21 = vld [vmem:[#allocation2 + $0x108] sm:$0xff] }
 0x1db   : > { %1338 = vst [vmem:[%s2443_s6 + $0x10] sm:$0xff] %v1634_v9  ;;  %v1636_v17 = vpack.c.bf16 %v1089_v14, %v1088_v12  ;;  %v1093_v20 = vld [vmem:[#allocation2 + $0x150] sm:$0xff]  ;;  %v1095_v23 = vld [vmem:[#allocation2 + $0x60] sm:$0xff]  ;;  %v1097_v25 = vld [vmem:[#allocation2 + $0x188] sm:$0xff] }
 0x1dc   : > { %1339 = vst [vmem:[%s2443_s6 + $0x18] sm:$0xff] %v1635_v13  ;;  %v1638_v22 = vpack.c.bf16 %v1093_v20, %v1092_v19  ;;  %v1096_v24 = vld [vmem:[#allocation2 + $0xe0] sm:$0xff]  ;;  %1341 = vst [vmem:[%s2443_s6 + $0x28] sm:$0xff] %v1637_v18  ;;  %v1639_v26 = vpack.c.bf16 %v1095_v23, %v1094_v21  ;;  %v1098_v28 = vld [vmem:[#allocation2 + $0x138] sm:$0xff] }
 0x1dd   : > { %1340 = vst [vmem:[%s2443_s6 + $0x20] sm:$0xff] %v1636_v17  ;;  %v1640_v27 = vpack.c.bf16 %v1097_v25, %v1096_v24  ;;  %v1099_v29 = vld [vmem:[#allocation2 + $0x140] sm:$0xff]  ;;  %v1101_v32 = vld [vmem:[#allocation2 + $0x1a8] sm:$0xff]  ;;  %v1102_v33 = vld [vmem:[#allocation2 + $0x1b8] sm:$0xff] }
 0x1de   : > { %v1100_v30 = vld [vmem:[#allocation2 + $0x80] sm:$0xff]  ;;  %1342 = vst [vmem:[%s2443_s6 + $0x30] sm:$0xff] %v1638_v22  ;;  %v1641_v31 = vpack.c.bf16 %v1099_v29, %v1098_v28  ;;  %v1103_v34 = vld [vmem:[#allocation2 + $0x28] sm:$0xff]  ;;  %1343 = vst [vmem:[%s2443_s6 + $0x38] sm:$0xff] %v1639_v26 }
 0x1df   : > { %1344 = vst [vmem:[%s2443_s6 + $0x40] sm:$0xff] %v1640_v27  ;;  %v1642_v35 = vpack.c.bf16 %v1101_v32, %v1100_v30  ;;  %v1643_v36 = vpack.c.bf16 %v1103_v34, %v1102_v33  ;;  %v1104_v37 = vld [vmem:[#allocation2 + $0x1e8] sm:$0xff]  ;;  %v1105_v38 = vld [vmem:[#allocation2 + $0xf8] sm:$0xff]  ;;  %v1106_v39 = vld [vmem:[#allocation2 + $0x160] sm:$0xff] }
 0x1e0   : > { %1345 = vst [vmem:[%s2443_s6 + $0x48] sm:$0xff] %v1641_v31  ;;  %v1644_v40 = vpack.c.bf16 %v1105_v38, %v1104_v37  ;;  %v1107_v41 = vld [vmem:[#allocation2 + $0x30] sm:$0xff]  ;;  %v1108_v42 = vld [vmem:[#allocation2 + $0x1e0] sm:$0xff]  ;;  %v1111_v47 = vld [vmem:[#allocation2 + $0x8] sm:$0xff] }
 0x1e1   : > { %v1109_v43 = vld [vmem:[#allocation2] sm:$0xff]  ;;  %1346 = vst [vmem:[%s2443_s6 + $0x50] sm:$0xff] %v1642_v35  ;;  %1347 = vst [vmem:[%s2443_s6 + $0x58] sm:$0xff] %v1643_v36  ;;  %v1645_v44 = vpack.c.bf16 %v1107_v41, %v1106_v39  ;;  %v1110_v46 = vld [vmem:[#allocation2 + $0xf0] sm:$0xff] }
 0x1e2   : > { %v1646_v45 = vpack.c.bf16 %v1109_v43, %v1108_v42  ;;  %v1112_v48 = vld [vmem:[#allocation2 + $0x148] sm:$0xff]  ;;  %1348 = vst [vmem:[%s2443_s6 + $0x60] sm:$0xff] %v1644_v40  ;;  %v1647_v49 = vpack.c.bf16 %v1111_v47, %v1110_v46  ;;  %v1113_v50 = vld [vmem:[#allocation2 + $0x1d0] sm:$0xff]  ;;  %v1114_v51 = vld [vmem:[#allocation2 + $0x100] sm:$0xff] }
 0x1e3   : > { %v1115_v52 = vld [vmem:[#allocation2 + $0xc8] sm:$0xff]  ;;  %1349 = vst [vmem:[%s2443_s6 + $0x68] sm:$0xff] %v1645_v44  ;;  %v1648_v53 = vpack.c.bf16 %v1113_v50, %v1112_v48  ;;  %v1116_v55 = vld [vmem:[#allocation2 + $0x40] sm:$0xff]  ;;  %v1117_v56 = vld [vmem:[#allocation2 + $0x1f8] sm:$0xff] }
 0x1e4   : > { %1350 = vst [vmem:[%s2443_s6 + $0x70] sm:$0xff] %v1646_v45  ;;  %v1649_v54 = vpack.c.bf16 %v1115_v52, %v1114_v51  ;;  %v1118_v57 = vld [vmem:[#allocation2 + $0x20] sm:$0xff]  ;;  %1351 = vst [vmem:[%s2443_s6 + $0x78] sm:$0xff] %v1647_v49  ;;  %v1650_v58 = vpack.c.bf16 %v1117_v56, %v1116_v55  ;;  %v1119_v59 = vld [vmem:[#allocation2 + $0x128] sm:$0xff] }
 0x1e5   : > { %v1120_v60 = vld [vmem:[#allocation2 + $0x1a0] sm:$0xff]  ;;  %v1121_v61 = vld [vmem:[#allocation2 + $0x1f0] sm:$0xff]  ;;  %1352 = vst [vmem:[%s2443_s6 + $0x80] sm:$0xff] %v1648_v53  ;;  %v1651_v62 = vpack.c.bf16 %v1119_v59, %v1118_v57  ;;  %v1122_v0 = vld [vmem:[#allocation2 + $0xe8] sm:$0xff] }
 0x1e6   : > { %1353 = vst [vmem:[%s2443_s6 + $0x88] sm:$0xff] %v1649_v54  ;;  %v1652_v63 = vpack.c.bf16 %v1121_v61, %v1120_v60  ;;  %v1123_v1 = vld [vmem:[#allocation2 + $0x78] sm:$0xff]  ;;  %v1124_v2 = vld [vmem:[#allocation2 + $0x70] sm:$0xff]  ;;  %1354 = vst [vmem:[%s2443_s6 + $0x90] sm:$0xff] %v1650_v58 }
 0x1e7   : > { %v1653_v3 = vpack.c.bf16 %v1123_v1, %v1122_v0  ;;  %v1125_v4 = vld [vmem:[#allocation2 + $0x90] sm:$0xff]  ;;  %v1126_v5 = vld [vmem:[#allocation2 + $0x1d8] sm:$0xff]  ;;  %1355 = vst [vmem:[%s2443_s6 + $0x98] sm:$0xff] %v1651_v62  ;;  %v1129_v10 = vld [vmem:[#allocation2 + $0x88] sm:$0xff] }
 0x1e8   : > { %v1127_v6 = vld [vmem:[#allocation2 + $0xd0] sm:$0xff]  ;;  %1356 = vst [vmem:[%s2443_s6 + $0xa0] sm:$0xff] %v1652_v63  ;;  %v1654_v7 = vpack.c.bf16 %v1125_v4, %v1124_v2  ;;  %v1128_v9 = vld [vmem:[#allocation2 + $0xb8] sm:$0xff]  ;;  %v1130_v11 = vld [vmem:[#allocation2 + $0xa8] sm:$0xff] }
 0x1e9   : > { %v1655_v8 = vpack.c.bf16 %v1127_v6, %v1126_v5  ;;  %1357 = vst [vmem:[%s2443_s6 + $0xa8] sm:$0xff] %v1653_v3  ;;  %v1656_v12 = vpack.c.bf16 %v1129_v10, %v1128_v9  ;;  %v1131_v13 = vld [vmem:[#allocation2 + $0x1c8] sm:$0xff]  ;;  %v1132_v14 = vld [vmem:[#allocation2 + $0x170] sm:$0xff]  ;;  %v1133_v15 = vld [vmem:[#allocation2 + $0x178] sm:$0xff] }
 0x1ea   : > { %1358 = vst [vmem:[%s2443_s6 + $0xb0] sm:$0xff] %v1654_v7  ;;  %v1657_v16 = vpack.c.bf16 %v1131_v13, %v1130_v11  ;;  %v1658_v17 = vpack.c.bf16 %v1133_v15, %v1132_v14  ;;  %v1134_v18 = vld [vmem:[#allocation2 + $0x68] sm:$0xff]  ;;  %v1135_v19 = vld [vmem:[#allocation2 + $0x190] sm:$0xff]  ;;  %v1136_v20 = vld [vmem:[#allocation2 + $0x198] sm:$0xff] }
 0x1eb   : > { %1359 = vst [vmem:[%s2443_s6 + $0xb8] sm:$0xff] %v1655_v8  ;;  %1360 = vst [vmem:[%s2443_s6 + $0xc0] sm:$0xff] %v1656_v12  ;;  %v1659_v21 = vpack.c.bf16 %v1135_v19, %v1134_v18  ;;  %v1137_v22 = vld [vmem:[#allocation2 + $0x38] sm:$0xff]  ;;  %v1138_v23 = vld [vmem:[#allocation2 + $0xc0] sm:$0xff] }
 0x1ec   : > { %v1139_v24 = vld [vmem:[#allocation2 + $0x1c0] sm:$0xff]  ;;  %1361 = vst [vmem:[%s2443_s6 + $0xc8] sm:$0xff] %v1657_v16  ;;  %1362 = vst [vmem:[%s2443_s6 + $0xd0] sm:$0xff] %v1658_v17  ;;  %v1660_v25 = vpack.c.bf16 %v1137_v22, %v1136_v20  ;;  %v1140_v27 = vld [vmem:[#allocation2 + $0x158] sm:$0xff] }
 0x1ed   : > { %v1661_v26 = vpack.c.bf16 %v1139_v24, %v1138_v23  ;;  %v1141_v28 = vld [vmem:[#allocation2 + $0x10] sm:$0xff]  ;;  %v1142_v29 = vld [vmem:[#allocation2 + $0x58] sm:$0xff]  ;;  %1363 = vst [vmem:[%s2443_s6 + $0xd8] sm:$0xff] %v1659_v21  ;;  %v1143_v31 = vld [vmem:[#allocation2 + $0xa0] sm:$0xff] }
 0x1ee   : > { %v1662_v30 = vpack.c.bf16 %v1141_v28, %v1140_v27  ;;  %1364 = vst [vmem:[%s2443_s6 + $0xe0] sm:$0xff] %v1660_v25  ;;  %v1663_v32 = vpack.c.bf16 %v1143_v31, %v1142_v29 }
 0x1ef   : > { %1365 = vst [vmem:[%s2443_s6 + $0xe8] sm:$0xff] %v1661_v26 }
 0x1f0   : > { %1366 = vst [vmem:[%s2443_s6 + $0xf0] sm:$0xff] %v1662_v30  ;;  %1367 = vst [vmem:[%s2443_s6 + $0xf8] sm:$0xff] %v1663_v32 }
 0x1f1 PF: > { %s2755_s8 = sld [smem:[#allocation14_spill]]  ;;  %s1385_s29 = sshll.u32 %s2443_s6, 4  ;;  %s2610_s29 = int_to_ptr.vmem [resolvable:$true] %s1385_s29 }
 0x1f2   : > { %s2756_s30 = sld [smem:[#allocation15_spill]]  ;;  %s2619_s15 = scalar_lea.sflag [#allocation5], %s230_s4 }
 0x1f3   : > { %s2757_s22 = sld [smem:[#allocation24_spill]]  ;;  %s2003_s3 = scalar_lea.vmem %s2610_s29, 4096 }
 0x1f4   : > { %p2004_p0 = scmp.ne.s32.totalorder %s2610_s29, %s2003_s3  ;;  %s2175_s6 = smov [#allocation8]  }
 0x1f5   : > { %s2007_s16 = sshll.u32 %s2175_s6, 4  ;;  %s2008_s16 = int_to_ptr.vmem [resolvable:$false] %s2007_s16 }
 0x1f6   : > { %p2005_p10 = pnand %p2004_p0, %p2384_p2  ;;  %s2009_s1 = scalar_lea.vmem %s2008_s16, 8192 }
 0x1f7   : > { %s1625_s27 = sshll.u32 %s2755_s8, 1  ;;  %p2010_p5 = scmp.lt.s32.totalorder %s2610_s29, %s2008_s16 }
 0x1f8   : > { %s1664_s5 = sshll.u32 %s2756_s30, 7  ;;  %p2006_p3 = pneg %p2005_p10 }
 0x1f9   : > { %s1382_s18 = sadd.s32 %s1664_s5, %s1625_s27  ;;  %s2758_s7 = smov %s2757_s22 }
 0x1fa   : > { %s1627_s26 = sshll.u32 %s1382_s18, 6  ;;  %p2011_p4 = scmp.lt.s32.totalorder %s2009_s1, %s2003_s3 }
 0x1fb   : > { %s2615_s23 = scalar_lea.hbm %s2757_s22, %s1627_s26 }
 0x1fc   : > { %p2012_p11 = por %p2011_p4, %p2010_p5 }
 0x1fe   : > { %p2013_p1 = pnand %p2012_p11, %p2006_p3 }
 0x200   : > { %2016 = shalt.err (!%p2013_p1)
}
 0x201   : > { %s2017_s4 = scalar_lea.hbm %s2615_s23, 4096  ;;  %s2021_s27 = scalar_lea.hbm %s2758_s7, 16384 }
 0x202   : > { %p2018_p12 = scmp.ne.s32.totalorder %s2615_s23, %s2017_s4  ;;  %p2022_p7 = scmp.lt.s32.totalorder %s2615_s23, %s2758_s7 }
 0x203   : > { %p2023_p8 = scmp.lt.s32.totalorder %s2021_s27, %s2017_s4 }
 0x204   : > { %p2019_p9 = pnand %p2018_p12, %p2384_p2 }
 0x205   : > { %p2024_p0 = por %p2023_p8, %p2022_p7 }
 0x206   : > { %p2020_p6 = pneg %p2019_p9 }
 0x208   : > { %p2025_p10 = pnand %p2024_p0, %p2020_p6 }
 0x20a   : > { %2028 = shalt.err (!%p2025_p10)
}
 0x20b   : > { %s2176_s26 = smov 128   ;;  %s2177_s12 = smov 256  }
 0x20c   : > { %s2178_s0 = smov 8  }
 0x20d   : > { %1701 = dma.vmem_to_hbm [thread:$0]  (%p2384_p2), %s2610_s29, 4096, %s2615_s23, %s2619_s15, %s2176_s26, %s2177_s12, %s2178_s0  }
 0x20e PF: > { %p1715_p3 = scmp.ge.s32.totalorder %s2167_s24, 2  ;;  %s1400_s22 = sand.u32 1, %s2107_s9  }
 0x20f   : > { %s1401_s3 = scalar_lea.sflag [#allocation5], %s1400_s22 }
 0x210   : > { %p1711_p5 = pnand %p1715_p3, %p2399_p13 }
 0x212   : > { %p1712_p4 = pneg %p1711_p5 }
 0x214   : > { %2102 = dma.done.wait (%p1712_p4), %s1401_s3, 4096  }
 0x215   : > { %2104 = vsyncadd (%p1712_p4), %s1401_s3, 4294963200  ;;  %s21_s24 = sadd.s32 1, %s2167_s24   ;;  %s2760_s15 = sld [smem:[#allocation12_spill]] }
 0x216   : > { %p2647_p11 = scmp.ge.s32.totalorder %s21_s24, 10   ;;  %s2761_s28 = sld [smem:[#allocation16_spill]] }
 0x217   : > { %s2762_s25 = sld [smem:[#allocation17_spill]]  ;;  %s2766_s9 = smov %s2111_s10 }
 0x218   : > { %s2763_s29 = sld [smem:[#allocation18_spill]]  ;;  %s2767_s10 = smov %s2115_s11 }
 0x219   : > { %s2764_s22 = sld [smem:[#allocation20_spill]]  ;;  %s2768_s11 = smov %s2397_s20 }
 0x21a   : > { %s2765_s23 = sld [smem:[#allocation21_spill]]  ;;  %s2769_s12 = smov %s2123_s13 }
 0x21b   : > { %s2770_s13 = smov %s2127_s14  ;;  %s2771_s14 = smov %s2378_s2 }
 0x21c   : > { %s2772_s16 = smov %s2139_s17  ;;  %s2773_s17 = smov %s2394_s19 }
 0x21d   : > { %s2774_s18 = smov %s2155_s21  ;;  %s2775_s19 = smov %s2761_s28 }
 0x21e   : > { %s2776_s20 = smov %s2762_s25  ;;  %s2777_s21 = smov %s2763_s29 }
 0x21f   :  { %20 = sbr.rel (!%p2647_p11) target bundleno = 17 (0x11), region = 94 }
 0x224   :  { %1406 = vsyncpa [#allocation4], 1 }
 0x225   :  { %1408 = vsyncpa [#allocation4 + $0x1], 1 }
 0x226   :  { %1409 = vsyncpa [#allocation7], 1 }
 0x227   :  { %1411 = vsyncpa [#allocation7 + $0x1], 1 }
 0x228   :  { %1412 = vsyncpa [#allocation5], 1 }
 0x229   :  { %1414 = vsyncpa [#allocation5 + $0x1], 1 }

</bundles_post_ra>
